<compile_context>
chip_gen: v5e
topology: v5e:2x2
jax: 0.10.0
libtpu: 0.0.40
codegen_flags: <defaults>
</compile_context>

<pallas_src>
import functools
import math

import jax
import jax.numpy as jnp
from jax import lax
from jax.experimental import pallas as pl
from jax.experimental.pallas import tpu as pltpu


_ACT_DTYPE = jnp.bfloat16          # MXU operand / streamed-activation dtype


def _query_vmem_bytes():
    try:
        return int(pltpu.get_tpu_info().vmem_capacity_bytes)
    except Exception:
        return 128 * 1024 * 1024


_PHYS_VMEM = _query_vmem_bytes()
_SMALL_VMEM = _PHYS_VMEM <= 64 * 1024 * 1024            # v7x-class: 64 MiB per TensorCore
_VMEM_LIMIT = (48 if _SMALL_VMEM else 64) * 1024 * 1024  # leave headroom for Mosaic scratch
# Generation-aware tile targets (clamped to real extents by _pick_tile).
_ROW_TILE = 256 if _SMALL_VMEM else 512       # sublane row tiles (bf16 -> multiple of 16)
_LANE_TILE = 512 if _SMALL_VMEM else 1024     # output-lane tiles
_K_TILE = 512 if _SMALL_VMEM else 1024        # contraction tiles
_FLASH_Q = 256 if _SMALL_VMEM else 512
_FLASH_K = 512


def _pick_tile(total, target, multiple):
    """Largest divisor of `total` that is a multiple of `multiple` and <= target.
    Falls back to the full extent (always a legal BlockSpec block)."""
    if total <= target:
        return total
    t = (target // multiple) * multiple
    while t >= multiple:
        if total % t == 0:
            return t
        t -= multiple
    return total


# ---------------------------------------------------------------------------
# Small in-kernel helpers (all f32 math on VMEM values)
# ---------------------------------------------------------------------------
def _ln_modulate(x, scale, shift, eps):
    """LayerNorm (no affine) fused with AdaLN: LN(x)*(1+scale)+shift."""
    mu = jnp.mean(x, axis=-1, keepdims=True)
    xc = x - mu
    var = jnp.mean(xc * xc, axis=-1, keepdims=True)
    return (xc * lax.rsqrt(var + eps)) * (1.0 + scale) + shift


def _rmsnorm(y, g, eps):
    inv = lax.rsqrt(jnp.mean(y * y, axis=-1, keepdims=True) + eps)
    return (y * inv) * g


# ---------------------------------------------------------------------------
# 1) Fused self-attn QKV: LN+AdaLN prologue, 3 projections sharing the x tile,
#    WanRMSNorm(q,k) + RoPE(q,k) epilogue.  q/k weights are column-permuted so
#    each head is laid out [real..., imag...] (transparent to attention scores).
# ---------------------------------------------------------------------------
def _qkv_rope_kernel(x_ref, scale_ref, shift_ref, cos_ref, sin_ref,
                     wq_ref, wk_ref, wv_ref, bq_ref, bk_ref, bv_ref,
                     gq_ref, gk_ref, q_ref, k_ref, v_ref,
                     *, eps, num_heads, head_dim):
    h = _ln_modulate(x_ref[0].astype(jnp.float32), scale_ref[0], shift_ref[0], eps)
    h = h.astype(wq_ref.dtype)                 # bf16 MXU operand
    cos = cos_ref[0]                           # (tl, head_dim // 2) f32
    sin = sin_ref[0]
    half = head_dim // 2

    def qk_proj(w_ref, b_ref, g_ref):
        y = jnp.dot(h, w_ref[...], preferred_element_type=jnp.float32) + b_ref[...]
        y = _rmsnorm(y, g_ref[...], eps)
        # RoPE on the de-interleaved per-head layout (contiguous slices only).
        pieces = []
        for n in range(num_heads):
            a = y[:, n * head_dim:n * head_dim + half]
            b = y[:, n * head_dim + half:(n + 1) * head_dim]
            pieces.append(a * cos - b * sin)
            pieces.append(a * sin + b * cos)
        return jnp.concatenate(pieces, axis=-1)

    q_ref[0] = qk_proj(wq_ref, bq_ref, gq_ref).astype(q_ref.dtype)
    k_ref[0] = qk_proj(wk_ref, bk_ref, gk_ref).astype(k_ref.dtype)
    v_ref[0] = (jnp.dot(h, wv_ref[...], preferred_element_type=jnp.float32)
                + bv_ref[...]).astype(v_ref.dtype)


def pallas_qkv_rope(x, scale, shift, cos, sin, wq, wk, wv, bq, bk, bv, gq, gk,
                    *, num_heads, head_dim, eps):
    B, L, C = x.shape
    half = head_dim // 2
    tl = _pick_tile(L, _ROW_TILE, 16)
    row = pl.BlockSpec((1, tl, C), lambda b, i: (b, i, 0))
    ang = pl.BlockSpec((1, tl, half), lambda b, i: (b, i, 0))
    bvec = pl.BlockSpec((1, 1, C), lambda b, i: (b, 0, 0))
    vec = pl.BlockSpec((1, C), lambda b, i: (0, 0))
    mat = pl.BlockSpec((C, C), lambda b, i: (0, 0))
    out = jax.ShapeDtypeStruct((B, L, C), _ACT_DTYPE)
    kernel = functools.partial(_qkv_rope_kernel, eps=eps,
                               num_heads=num_heads, head_dim=head_dim)
    return pl.pallas_call(
        kernel,
        out_shape=(out, out, out),
        grid_spec=pltpu.PrefetchScalarGridSpec(
            num_scalar_prefetch=0,
            grid=(B, L // tl),
            in_specs=[row, bvec, bvec, ang, ang, mat, mat, mat,
                      vec, vec, vec, vec, vec],
            out_specs=(row, row, row)),
        compiler_params=pltpu.CompilerParams(
            dimension_semantics=("parallel", "parallel"),
            vmem_limit_bytes=_VMEM_LIMIT),
        cost_estimate=pl.CostEstimate(
            flops=int(6 * B * L * C * C),
            transcendentals=int(2 * B * L),
            bytes_accessed=int(B * L * C * 4 + 3 * C * C * 2 + 3 * B * L * C * 2)),
    )(x, scale, shift, cos, sin, wq, wk, wv, bq, bk, bv, gq, gk)


# ---------------------------------------------------------------------------
# 2) Cross-attention Q projection: affine LayerNorm (norm3) prologue + RMSNorm
# ---------------------------------------------------------------------------
def _ln_q_kernel(x_ref, scale_ref, shift_ref, w_ref, b_ref, g_ref, o_ref, *, eps):
    h = _ln_modulate(x_ref[0].astype(jnp.float32), scale_ref[0], shift_ref[0], eps)
    h = h.astype(w_ref.dtype)
    y = jnp.dot(h, w_ref[...], preferred_element_type=jnp.float32) + b_ref[...]
    o_ref[0] = _rmsnorm(y, g_ref[...], eps).astype(o_ref.dtype)


def pallas_ln_q_proj(x, scale, shift, w, b, g, *, eps):
    B, L, C = x.shape
    tl = _pick_tile(L, _ROW_TILE, 16)
    row = pl.BlockSpec((1, tl, C), lambda bb, i: (bb, i, 0))
    bvec = pl.BlockSpec((1, 1, C), lambda bb, i: (bb, 0, 0))
    vec = pl.BlockSpec((1, C), lambda bb, i: (0, 0))
    mat = pl.BlockSpec((C, C), lambda bb, i: (0, 0))
    return pl.pallas_call(
        functools.partial(_ln_q_kernel, eps=eps),
        out_shape=jax.ShapeDtypeStruct((B, L, C), _ACT_DTYPE),
        grid_spec=pltpu.PrefetchScalarGridSpec(
            num_scalar_prefetch=0, grid=(B, L // tl),
            in_specs=[row, bvec, bvec, mat, vec, vec],
            out_specs=row),
        compiler_params=pltpu.CompilerParams(
            dimension_semantics=("parallel", "parallel"),
            vmem_limit_bytes=_VMEM_LIMIT),
    )(x, scale, shift, w, b, g)


# ---------------------------------------------------------------------------
# 3) Cross-attention K/V projections sharing the context tile (RMSNorm on K)
# ---------------------------------------------------------------------------
def _kv_kernel(c_ref, wk_ref, wv_ref, bk_ref, bv_ref, gk_ref, k_ref, v_ref, *, eps):
    c = c_ref[0].astype(wk_ref.dtype)
    yk = jnp.dot(c, wk_ref[...], preferred_element_type=jnp.float32) + bk_ref[...]
    k_ref[0] = _rmsnorm(yk, gk_ref[...], eps).astype(k_ref.dtype)
    v_ref[0] = (jnp.dot(c, wv_ref[...], preferred_element_type=jnp.float32)
                + bv_ref[...]).astype(v_ref.dtype)


def pallas_kv_proj(ctx, wk, wv, bk, bv, gk, *, eps):
    B, Lc, C = ctx.shape
    tl = _pick_tile(Lc, _ROW_TILE, 16)
    row = pl.BlockSpec((1, tl, C), lambda b, i: (b, i, 0))
    vec = pl.BlockSpec((1, C), lambda b, i: (0, 0))
    mat = pl.BlockSpec((C, C), lambda b, i: (0, 0))
    out = jax.ShapeDtypeStruct((B, Lc, C), _ACT_DTYPE)
    return pl.pallas_call(
        functools.partial(_kv_kernel, eps=eps),
        out_shape=(out, out),
        grid_spec=pltpu.PrefetchScalarGridSpec(
            num_scalar_prefetch=0, grid=(B, Lc // tl),
            in_specs=[row, mat, mat, vec, vec, vec],
            out_specs=(row, row)),
        compiler_params=pltpu.CompilerParams(
            dimension_semantics=("parallel", "parallel"),
            vmem_limit_bytes=_VMEM_LIMIT),
    )(ctx, wk, wv, bk, bv, gk)


# ---------------------------------------------------------------------------
# 4) FFN up-projection: LN+AdaLN prologue + matmul + tanh-GELU (bf16 out)
# ---------------------------------------------------------------------------
def _ln_gelu_kernel(x_ref, scale_ref, shift_ref, w_ref, b_ref, o_ref, *, eps):
    h = _ln_modulate(x_ref[0].astype(jnp.float32), scale_ref[0], shift_ref[0], eps)
    h = h.astype(w_ref.dtype)
    y = jnp.dot(h, w_ref[...], preferred_element_type=jnp.float32) + b_ref[...]
    o_ref[0] = jax.nn.gelu(y, approximate=True).astype(o_ref.dtype)


def pallas_ln_ffn1(x, scale, shift, w, b, *, eps):
    B, L, C = x.shape
    Nout = w.shape[1]
    tl = _pick_tile(L, _ROW_TILE, 16)
    tn = _pick_tile(Nout, _LANE_TILE, 128)
    return pl.pallas_call(
        functools.partial(_ln_gelu_kernel, eps=eps),
        out_shape=jax.ShapeDtypeStruct((B, L, Nout), _ACT_DTYPE),
        grid_spec=pltpu.PrefetchScalarGridSpec(
            num_scalar_prefetch=0, grid=(B, L // tl, Nout // tn),
            in_specs=[
                pl.BlockSpec((1, tl, C), lambda b, i, n: (b, i, 0)),
                pl.BlockSpec((1, 1, C), lambda b, i, n: (b, 0, 0)),
                pl.BlockSpec((1, 1, C), lambda b, i, n: (b, 0, 0)),
                pl.BlockSpec((C, tn), lambda b, i, n: (0, n)),
                pl.BlockSpec((1, tn), lambda b, i, n: (0, n)),
            ],
            out_specs=pl.BlockSpec((1, tl, tn), lambda b, i, n: (b, i, n))),
        compiler_params=pltpu.CompilerParams(
            dimension_semantics=("parallel", "parallel", "parallel"),
            vmem_limit_bytes=_VMEM_LIMIT),
        cost_estimate=pl.CostEstimate(
            flops=int(2 * B * L * C * Nout),
            transcendentals=int(B * L * Nout),
            bytes_accessed=int(B * L * C * 4 + C * Nout * 2 + B * L * Nout * 2)),
    )(x, scale, shift, w, b)


# ---------------------------------------------------------------------------
# 5) Output projection with the gated residual fused into the epilogue
#    (self-attn o * e2, cross-attn o plain add, FFN2 * e5); residual aliased.
# ---------------------------------------------------------------------------
def _linear_res_kernel(res_ref, gate_ref, a_ref, w_ref, b_ref, o_ref, acc_ref,
                       *, with_gate):
    kk = pl.program_id(2)

    @pl.when(kk == 0)
    def _():
        acc_ref[...] = jnp.zeros(acc_ref.shape, acc_ref.dtype)

    acc_ref[...] += jnp.dot(a_ref[0], w_ref[...], preferred_element_type=jnp.float32)

    @pl.when(kk == pl.num_programs(2) - 1)
    def _():
        y = acc_ref[...] + b_ref[...]
        if with_gate:
            y = y * gate_ref[0]
        o_ref[0] = (res_ref[0].astype(jnp.float32) + y).astype(o_ref.dtype)


def pallas_linear_residual(res, gate, act, w, b, *, with_gate):
    """out = res + (act @ w + b) [* gate]; the residual buffer is aliased in place."""
    B, L, C = res.shape
    K = act.shape[-1]
    tl = _pick_tile(L, _ROW_TILE, 16)
    tk = _pick_tile(K, _K_TILE, 128)
    return pl.pallas_call(
        functools.partial(_linear_res_kernel, with_gate=with_gate),
        out_shape=jax.ShapeDtypeStruct((B, L, C), res.dtype),
        grid_spec=pltpu.PrefetchScalarGridSpec(
            num_scalar_prefetch=0, grid=(B, L // tl, K // tk),
            in_specs=[
                pl.BlockSpec((1, tl, C), lambda bb, i, k: (bb, i, 0)),   # residual
                pl.BlockSpec((1, 1, C), lambda bb, i, k: (bb, 0, 0)),    # gate
                pl.BlockSpec((1, tl, tk), lambda bb, i, k: (bb, i, k)),  # activation
                pl.BlockSpec((tk, C), lambda bb, i, k: (k, 0)),          # weight
                pl.BlockSpec((1, C), lambda bb, i, k: (0, 0)),           # bias
            ],
            out_specs=pl.BlockSpec((1, tl, C), lambda bb, i, k: (bb, i, 0)),
            scratch_shapes=[pltpu.VMEM((tl, C), jnp.float32)]),
        compiler_params=pltpu.CompilerParams(
            dimension_semantics=("parallel", "parallel", "arbitrary"),
            vmem_limit_bytes=_VMEM_LIMIT),
        input_output_aliases={0: 0},
        cost_estimate=pl.CostEstimate(
            flops=int(2 * B * L * K * C + 3 * B * L * C),
            transcendentals=0,
            bytes_accessed=int(2 * B * L * C * 4 + B * L * K * 2 + K * C * 2)),
    )(res, gate, act, w, b)


# ---------------------------------------------------------------------------
# 6) Flash attention on [B, L, C] (heads iterated in-kernel, k_lens masking)
# ---------------------------------------------------------------------------
def _flash_kernel(lens_ref, q_ref, k_ref, v_ref, o_ref, m_sc, l_sc, acc_sc,
                  *, sm_scale, num_heads, head_dim):
    b = pl.program_id(0)
    j = pl.program_id(2)
    tk = k_ref.shape[1]
    klen = lens_ref[b]

    @pl.when(j == 0)
    def _():
        m_sc[...] = jnp.full(m_sc.shape, -1e30, m_sc.dtype)
        l_sc[...] = jnp.zeros(l_sc.shape, l_sc.dtype)
        acc_sc[...] = jnp.zeros(acc_sc.shape, acc_sc.dtype)

    @pl.when(j * tk < klen)                       # skip fully-masked KV tiles
    def _():
        q = q_ref[0]                              # (tq, C) bf16
        k = k_ref[0]                              # (tk, C) bf16
        v = v_ref[0]
        col = j * tk + lax.broadcasted_iota(jnp.int32, (1, tk), 1)
        valid = col < klen
        for n in range(num_heads):
            sl = slice(n * head_dim, (n + 1) * head_dim)
            s = lax.dot_general(q[:, sl], k[:, sl],
                                (((1,), (1,)), ((), ())),
                                preferred_element_type=jnp.float32) * sm_scale
            s = jnp.where(valid, s, -1e30)
            m_prev = m_sc[n]
            m_new = jnp.maximum(m_prev, jnp.max(s, axis=-1, keepdims=True))
            alpha = jnp.exp(m_prev - m_new)
            p = jnp.where(valid, jnp.exp(s - m_new), 0.0)
            l_sc[n] = alpha * l_sc[n] + jnp.sum(p, axis=-1, keepdims=True)
            acc_sc[n] = alpha * acc_sc[n] + jnp.dot(
                p.astype(v.dtype), v[:, sl], preferred_element_type=jnp.float32)
            m_sc[n] = m_new

    @pl.when(j == pl.num_programs(2) - 1)
    def _():
        heads = []
        for n in range(num_heads):
            inv = pl.reciprocal(jnp.maximum(l_sc[n], 1e-20), approx=True)
            heads.append(acc_sc[n] * inv)
        o_ref[0] = jnp.concatenate(heads, axis=-1).astype(o_ref.dtype)


def pallas_flash_attention(q, k, v, k_lens, *, num_heads, head_dim):
    """softmax(q k^T / sqrt(D)) v per head; keys >= k_lens[b] are masked.
    q: [B,Lq,C] bf16; k,v: [B,Lk,C] bf16 (C = num_heads*head_dim); k_lens: [B]."""
    B, Lq, C = q.shape
    Lk = k.shape[1]
    sm_scale = 1.0 / math.sqrt(head_dim)
    tq = _pick_tile(Lq, _FLASH_Q, 16)
    tk = _pick_tile(Lk, _FLASH_K, 128)            # lane-dense score tiles when Lk allows
    lens = jnp.asarray(k_lens, jnp.int32)
    kernel = functools.partial(_flash_kernel, sm_scale=sm_scale,
                               num_heads=num_heads, head_dim=head_dim)
    return pl.pallas_call(
        kernel,
        out_shape=jax.ShapeDtypeStruct((B, Lq, C), q.dtype),
        grid_spec=pltpu.PrefetchScalarGridSpec(
            num_scalar_prefetch=1,
            grid=(B, Lq // tq, Lk // tk),
            in_specs=[
                pl.BlockSpec((1, tq, C), lambda b, i, j, lens_ref: (b, i, 0)),
                pl.BlockSpec((1, tk, C), lambda b, i, j, lens_ref: (b, j, 0)),
                pl.BlockSpec((1, tk, C), lambda b, i, j, lens_ref: (b, j, 0)),
            ],
            out_specs=pl.BlockSpec((1, tq, C), lambda b, i, j, lens_ref: (b, i, 0)),
            scratch_shapes=[
                pltpu.VMEM((num_heads, tq, 1), jnp.float32),          # running max
                pltpu.VMEM((num_heads, tq, 1), jnp.float32),          # running denom
                pltpu.VMEM((num_heads, tq, head_dim), jnp.float32),   # accumulator
            ]),
        compiler_params=pltpu.CompilerParams(
            dimension_semantics=("parallel", "parallel", "arbitrary"),
            vmem_limit_bytes=_VMEM_LIMIT),
        cost_estimate=pl.CostEstimate(
            flops=int(4 * B * Lq * Lk * C),
            transcendentals=int(2 * B * num_heads * Lq * Lk),
            bytes_accessed=int(2 * B * (Lq + Lk) * C * 2)),
    )(lens, q, k, v)


# ---------------------------------------------------------------------------
# RoPE tables (built once per forward, f32)
# ---------------------------------------------------------------------------
def build_rope_tables(head_dim, max_len=1024, theta=10000.0):
    c = head_dim // 2
    parts = (c - 2 * (c // 3), c // 3, c // 3)
    tables = []
    for part in parts:
        axis_dim = 2 * part
        inv = 1.0 / (theta ** (jnp.arange(0, axis_dim, 2, dtype=jnp.float32) / axis_dim))
        tables.append(jnp.outer(jnp.arange(max_len, dtype=jnp.float32), inv))
    return tuple(tables)   # angle tables for the (F, H, W) axes


def build_rope_cos_sin(grid_sizes, seq_len, rope_tables):
    """Per-position angles -> (cos, sin) of shape [B, seq_len, head_dim//2] (f32).
    Positions beyond f*h*w get cos=1, sin=0 (pass-through, as in the torch code)."""
    ang_f, ang_h, ang_w = rope_tables
    cos_rows, sin_rows = [], []
    for (f, h, w) in grid_sizes:
        seq = f * h * w
        ang = jnp.concatenate([
            jnp.broadcast_to(ang_f[:f][:, None, None, :], (f, h, w, ang_f.shape[1])),
            jnp.broadcast_to(ang_h[:h][None, :, None, :], (f, h, w, ang_h.shape[1])),
            jnp.broadcast_to(ang_w[:w][None, None, :, :], (f, h, w, ang_w.shape[1])),
        ], axis=-1).reshape(seq, -1)
        pad = seq_len - seq
        cos = jnp.concatenate([jnp.cos(ang), jnp.ones((pad, ang.shape[1]), jnp.float32)], 0)
        sin = jnp.concatenate([jnp.sin(ang), jnp.zeros((pad, ang.shape[1]), jnp.float32)], 0)
        cos_rows.append(cos)
        sin_rows.append(sin)
    return jnp.stack(cos_rows), jnp.stack(sin_rows)


def _rope_deinterleave_perm(num_heads, head_dim):
    """Column permutation grouping each head's RoPE pairs as [real..., imag...].
    Applying it identically to q and k weights is transparent to the scores."""
    half = head_dim // 2
    idx = []
    for n in range(num_heads):
        base = n * head_dim
        idx.extend(base + 2 * j for j in range(half))
        idx.extend(base + 2 * j + 1 for j in range(half))
    return jnp.asarray(idx, dtype=jnp.int32)


# ---------------------------------------------------------------------------
# WanAttentionBlock forward (Pallas path)
# ---------------------------------------------------------------------------
def wan_attention_block_pallas(p, x, e, seq_lens, grid_sizes, context, context_lens,
                               *, num_heads, eps, rope_tables):
    """t2v cross-attention, qk_norm=True, cross_attn_norm=True, window_size=(-1,-1)."""
    B, L, C = x.shape
    D = C // num_heads
    bf = lambda a: a.astype(_ACT_DTYPE)

    # AdaLN modulation: (modulation + e).chunk(6) - tiny [B,6,C] op, plain JAX (f32).
    e_mod = p["modulation"] + e.astype(jnp.float32)
    e0, e1, e2, e3, e4, e5 = [e_mod[:, i:i + 1, :] for i in range(6)]

    cos, sin = build_rope_cos_sin(grid_sizes, L, rope_tables)
    perm = _rope_deinterleave_perm(num_heads, D)

    # ---- self-attention: fused LN+mod -> QKV -> RMSNorm -> RoPE, then flash ----
    q, k, v = pallas_qkv_rope(
        x, e1, e0, cos, sin,
        bf(p["sa_q_w"][:, perm]), bf(p["sa_k_w"][:, perm]), bf(p["sa_v_w"]),
        p["sa_q_b"][perm].reshape(1, C), p["sa_k_b"][perm].reshape(1, C),
        p["sa_v_b"].reshape(1, C),
        p["sa_gq"][perm].reshape(1, C), p["sa_gk"][perm].reshape(1, C),
        num_heads=num_heads, head_dim=D, eps=eps)
    a = pallas_flash_attention(q, k, v, seq_lens, num_heads=num_heads, head_dim=D)
    x = pallas_linear_residual(x, e2, a, bf(p["sa_o_w"]),
                               p["sa_o_b"].reshape(1, C), with_gate=True)

    # ---- cross-attention (t2v); norm3 affine LN folded into the q-projection prologue ----
    n3_scale = jnp.broadcast_to((p["norm3_w"] - 1.0).reshape(1, 1, C), (B, 1, C))
    n3_shift = jnp.broadcast_to(p["norm3_b"].reshape(1, 1, C), (B, 1, C))
    qc = pallas_ln_q_proj(x, n3_scale, n3_shift, bf(p["ca_q_w"]),
                          p["ca_q_b"].reshape(1, C), p["ca_gq"].reshape(1, C), eps=eps)
    kc, vc = pallas_kv_proj(bf(context), bf(p["ca_k_w"]), bf(p["ca_v_w"]),
                            p["ca_k_b"].reshape(1, C), p["ca_v_b"].reshape(1, C),
                            p["ca_gk"].reshape(1, C), eps=eps)
    a = pallas_flash_attention(qc, kc, vc, context_lens, num_heads=num_heads, head_dim=D)
    ones_gate = jnp.ones((B, 1, C), jnp.float32)
    x = pallas_linear_residual(x, ones_gate, a, bf(p["ca_o_w"]),
                               p["ca_o_b"].reshape(1, C), with_gate=False)

    # ---- FFN: fused LN+mod -> up-proj -> GELU, then down-proj with fused gated residual ----
    hidden = pallas_ln_ffn1(x, e4, e3, bf(p["ffn1_w"]),
                            p["ffn1_b"].reshape(1, -1), eps=eps)
    x = pallas_linear_residual(x, e5, hidden, bf(p["ffn2_w"]),
                               p["ffn2_b"].reshape(1, C), with_gate=True)
    return x


# ---------------------------------------------------------------------------
# Pure-JAX reference (mirrors the torch forward with the same bf16 matmul
# operands / f32 accumulation), for the correctness check
# ---------------------------------------------------------------------------
def _bf16(a):
    return a.astype(jnp.bfloat16)


def _ref_mm(a, w):
    return jnp.einsum("blc,cn->bln", _bf16(a), _bf16(w),
                      preferred_element_type=jnp.float32)


def _ref_layernorm(x, eps):
    xf = x.astype(jnp.float32)
    mu = jnp.mean(xf, axis=-1, keepdims=True)
    var = jnp.mean((xf - mu) ** 2, axis=-1, keepdims=True)
    return (xf - mu) * lax.rsqrt(var + eps)


def _ref_rmsnorm(y, g, eps):
    inv = lax.rsqrt(jnp.mean(y * y, axis=-1, keepdims=True) + eps)
    return (y * inv) * g


def _ref_rope(x, cos, sin):
    B, L, N, D = x.shape
    xr = x.reshape(B, L, N, D // 2, 2)
    a, b = xr[..., 0], xr[..., 1]
    c = cos[:, :, None, :]
    s = sin[:, :, None, :]
    return jnp.stack([a * c - b * s, a * s + b * c], axis=-1).reshape(B, L, N, D)


def _ref_attention(q, k, v, k_lens, num_heads):
    B, Lq, C = q.shape
    D = C // num_heads
    qh = q.reshape(B, Lq, num_heads, D)
    kh = k.reshape(B, -1, num_heads, D)
    vh = v.reshape(B, -1, num_heads, D)
    s = jnp.einsum("bind,bjnd->bnij", _bf16(qh), _bf16(kh),
                   preferred_element_type=jnp.float32) / math.sqrt(D)
    mask = jnp.arange(k.shape[1])[None, :] < jnp.asarray(k_lens, jnp.int32)[:, None]
    s = jnp.where(mask[:, None, None, :], s, -1e30)
    p = jax.nn.softmax(s, axis=-1)
    o = jnp.einsum("bnij,bjnd->bind", _bf16(p), _bf16(vh),
                   preferred_element_type=jnp.float32)
    return o.reshape(B, Lq, C)


def wan_attention_block_reference(p, x, e, seq_lens, grid_sizes, context, context_lens,
                                  *, num_heads, eps, rope_tables):
    B, L, C = x.shape
    D = C // num_heads
    cos, sin = build_rope_cos_sin(grid_sizes, L, rope_tables)

    e_mod = p["modulation"] + e.astype(jnp.float32)
    e0, e1, e2, e3, e4, e5 = [e_mod[:, i:i + 1, :] for i in range(6)]

    h = _ref_layernorm(x, eps) * (1.0 + e1) + e0
    q = _ref_rmsnorm(_ref_mm(h, p["sa_q_w"]) + p["sa_q_b"], p["sa_gq"], eps)
    k = _ref_rmsnorm(_ref_mm(h, p["sa_k_w"]) + p["sa_k_b"], p["sa_gk"], eps)
    v = _ref_mm(h, p["sa_v_w"]) + p["sa_v_b"]
    q = _ref_rope(q.reshape(B, L, num_heads, D), cos, sin).reshape(B, L, C)
    k = _ref_rope(k.reshape(B, L, num_heads, D), cos, sin).reshape(B, L, C)
    a = _ref_attention(q, k, v, seq_lens, num_heads)
    x = x + (_ref_mm(a, p["sa_o_w"]) + p["sa_o_b"]) * e2

    xn = _ref_layernorm(x, eps) * p["norm3_w"] + p["norm3_b"]
    q = _ref_rmsnorm(_ref_mm(xn, p["ca_q_w"]) + p["ca_q_b"], p["ca_gq"], eps)
    k = _ref_rmsnorm(_ref_mm(context, p["ca_k_w"]) + p["ca_k_b"], p["ca_gk"], eps)
    v = _ref_mm(context, p["ca_v_w"]) + p["ca_v_b"]
    a = _ref_attention(q, k, v, context_lens, num_heads)
    x = x + (_ref_mm(a, p["ca_o_w"]) + p["ca_o_b"])

    h = _ref_layernorm(x, eps) * (1.0 + e4) + e3
    y = jax.nn.gelu(_ref_mm(h, p["ffn1_w"]) + p["ffn1_b"], approximate=True)
    y = _ref_mm(y, p["ffn2_w"]) + p["ffn2_b"]
    x = x + y * e5
    return x


# ---------------------------------------------------------------------------
# Deterministic parameter init (torch defaults; weights pre-transposed [in,out])
# ---------------------------------------------------------------------------
def init_params(key, dim, ffn_dim):
    keys = jax.random.split(key, 11)

    def linear_init(k, din, dout):
        kw, kb = jax.random.split(k)
        bound = 1.0 / math.sqrt(din)
        w = jax.random.uniform(kw, (din, dout), jnp.float32, -bound, bound)
        b = jax.random.uniform(kb, (dout,), jnp.float32, -bound, bound)
        return w, b

    p = {"modulation": jax.random.normal(keys[0], (1, 6, dim), jnp.float32) / math.sqrt(dim)}
    for i, nm in enumerate(["sa_q", "sa_k", "sa_v", "sa_o", "ca_q", "ca_k", "ca_v", "ca_o"]):
        w, b = linear_init(keys[1 + i], dim, dim)
        p[nm + "_w"], p[nm + "_b"] = w, b
    p["ffn1_w"], p["ffn1_b"] = linear_init(keys[9], dim, ffn_dim)
    p["ffn2_w"], p["ffn2_b"] = linear_init(keys[10], ffn_dim, dim)
    ones = jnp.ones((dim,), jnp.float32)
    p.update(sa_gq=ones, sa_gk=ones, ca_gq=ones, ca_gk=ones,
             norm3_w=ones, norm3_b=jnp.zeros((dim,), jnp.float32))
    return p


if __name__ == "__main__":
    key = jax.random.PRNGKey(0)
    B, L, C, N_HEADS, FFN, LC = 2, 64, 128, 2, 256, 32
    D = C // N_HEADS
    EPS = 1e-6

    kx, ke, kc, kp = jax.random.split(key, 4)
    x = jax.random.normal(kx, (B, L, C), jnp.float32)
    e = jax.random.normal(ke, (B, 6, C), jnp.float32)          # f32, as asserted in torch
    context = jax.random.normal(kc, (B, LC, C), jnp.float32)

    grid_sizes = [(4, 4, 4), (2, 4, 4)]                        # (F, H, W) per sample
    seq_lens = [f * h * w for f, h, w in grid_sizes]           # [64, 32]
    context_lens = [32, 24]

    params = init_params(kp, C, FFN)
    rope_tables = build_rope_tables(D)

    # Reference first (the Pallas path aliases residual buffers in place).
    ref = wan_attention_block_reference(params, x, e, seq_lens, grid_sizes, context,
                                        context_lens, num_heads=N_HEADS, eps=EPS,
                                        rope_tables=rope_tables)
    ref = jax.block_until_ready(ref)

    out = wan_attention_block_pallas(params, x, e, seq_lens, grid_sizes, context,
                                     context_lens, num_heads=N_HEADS, eps=EPS,
                                     rope_tables=rope_tables)
    out = jax.block_until_ready(out)

    assert out.shape == (B, L, C) and out.dtype == x.dtype
    max_err = float(jnp.max(jnp.abs(out - ref)))
    assert max_err < 1e-1, f"mismatch vs pure-JAX reference (max abs err = {max_err})"
    print("KERNEL_OK")
</pallas_src>

<mosaic_0001>
module attributes {stable_mosaic.version = 11 : i64} {
  func.func @_qkv_rope_kernel(%arg0: i32, %arg1: i32, %arg2: memref<1x64x128xf32, #tpu.memory_space<vmem>>, %arg3: memref<1x1x128xf32, #tpu.memory_space<vmem>>, %arg4: memref<1x1x128xf32, #tpu.memory_space<vmem>>, %arg5: memref<1x64x32xf32, #tpu.memory_space<vmem>>, %arg6: memref<1x64x32xf32, #tpu.memory_space<vmem>>, %arg7: memref<128x128xbf16, #tpu.memory_space<vmem>>, %arg8: memref<128x128xbf16, #tpu.memory_space<vmem>>, %arg9: memref<128x128xbf16, #tpu.memory_space<vmem>>, %arg10: memref<1x128xf32, #tpu.memory_space<vmem>>, %arg11: memref<1x128xf32, #tpu.memory_space<vmem>>, %arg12: memref<1x128xf32, #tpu.memory_space<vmem>>, %arg13: memref<1x128xf32, #tpu.memory_space<vmem>>, %arg14: memref<1x128xf32, #tpu.memory_space<vmem>>, %arg15: memref<1x64x128xbf16, #tpu.memory_space<vmem>>, %arg16: memref<1x64x128xbf16, #tpu.memory_space<vmem>>, %arg17: memref<1x64x128xbf16, #tpu.memory_space<vmem>>) attributes {dimension_semantics = [#tpu.dimension_semantics<parallel>, #tpu.dimension_semantics<parallel>], iteration_bounds = array<i64: 2, 1>, scalar_prefetch = 0 : i64, scratch_operands = 0 : i64, tpu.core_type = #tpu.core_type<tc>, window_params = [{transform_indices = @transform_0, window_bounds = array<i64: 1, 64, 128>}, {transform_indices = @transform_1, window_bounds = array<i64: 1, 1, 128>}, {transform_indices = @transform_2, window_bounds = array<i64: 1, 1, 128>}, {transform_indices = @transform_3, window_bounds = array<i64: 1, 64, 32>}, {transform_indices = @transform_4, window_bounds = array<i64: 1, 64, 32>}, {pipeline_mode = #tpu.pipeline_mode<synchronous>, transform_indices = @transform_5, window_bounds = array<i64: 128, 128>}, {pipeline_mode = #tpu.pipeline_mode<synchronous>, transform_indices = @transform_6, window_bounds = array<i64: 128, 128>}, {pipeline_mode = #tpu.pipeline_mode<synchronous>, transform_indices = @transform_7, window_bounds = array<i64: 128, 128>}, {pipeline_mode = #tpu.pipeline_mode<synchronous>, transform_indices = @transform_8, window_bounds = array<i64: 1, 128>}, {pipeline_mode = #tpu.pipeline_mode<synchronous>, transform_indices = @transform_9, window_bounds = array<i64: 1, 128>}, {pipeline_mode = #tpu.pipeline_mode<synchronous>, transform_indices = @transform_10, window_bounds = array<i64: 1, 128>}, {pipeline_mode = #tpu.pipeline_mode<synchronous>, transform_indices = @transform_11, window_bounds = array<i64: 1, 128>}, {pipeline_mode = #tpu.pipeline_mode<synchronous>, transform_indices = @transform_12, window_bounds = array<i64: 1, 128>}, {transform_indices = @transform_13, window_bounds = array<i64: 1, 64, 128>}, {transform_indices = @transform_14, window_bounds = array<i64: 1, 64, 128>}, {transform_indices = @transform_15, window_bounds = array<i64: 1, 64, 128>}]} {
    %c0 = arith.constant 0 : index
    %c0_0 = arith.constant 0 : index
    %c0_1 = arith.constant 0 : index
    %0 = vector.load %arg2[%c0, %c0_0, %c0_1] : memref<1x64x128xf32, #tpu.memory_space<vmem>>, vector<1x64x128xf32>
    %1 = vector.shape_cast %0 : vector<1x64x128xf32> to vector<64x128xf32>
    %c0_2 = arith.constant 0 : index
    %c0_3 = arith.constant 0 : index
    %c0_4 = arith.constant 0 : index
    %2 = vector.load %arg3[%c0_2, %c0_3, %c0_4] : memref<1x1x128xf32, #tpu.memory_space<vmem>>, vector<1x1x128xf32>
    %3 = vector.shape_cast %2 : vector<1x1x128xf32> to vector<1x128xf32>
    %c0_5 = arith.constant 0 : index
    %c0_6 = arith.constant 0 : index
    %c0_7 = arith.constant 0 : index
    %4 = vector.load %arg4[%c0_5, %c0_6, %c0_7] : memref<1x1x128xf32, #tpu.memory_space<vmem>>, vector<1x1x128xf32>
    %5 = vector.shape_cast %4 : vector<1x1x128xf32> to vector<1x128xf32>
    %cst = arith.constant dense<0.000000e+00> : vector<64xf32>
    %6 = vector.multi_reduction <add>, %1, %cst [1] : vector<64x128xf32> to vector<64xf32>
    %7 = vector.shape_cast %6 : vector<64xf32> to vector<64x1xf32>
    %cst_8 = arith.constant 1.280000e+02 : f32
    %8 = vector.broadcast %cst_8 : f32 to vector<64x1xf32>
    %9 = arith.divf %7, %8 : vector<64x1xf32>
    %10 = vector.broadcast %9 : vector<64x1xf32> to vector<64x128xf32>
    %11 = arith.subf %1, %10 : vector<64x128xf32>
    %12 = arith.mulf %11, %11 : vector<64x128xf32>
    %cst_9 = arith.constant dense<0.000000e+00> : vector<64xf32>
    %13 = vector.multi_reduction <add>, %12, %cst_9 [1] : vector<64x128xf32> to vector<64xf32>
    %14 = vector.shape_cast %13 : vector<64xf32> to vector<64x1xf32>
    %cst_10 = arith.constant 1.280000e+02 : f32
    %15 = vector.broadcast %cst_10 : f32 to vector<64x1xf32>
    %16 = arith.divf %14, %15 : vector<64x1xf32>
    %cst_11 = arith.constant 9.99999997E-7 : f32
    %17 = vector.broadcast %cst_11 : f32 to vector<64x1xf32>
    %18 = arith.addf %16, %17 : vector<64x1xf32>
    %19 = math.rsqrt %18 : vector<64x1xf32>
    %20 = vector.broadcast %19 : vector<64x1xf32> to vector<64x128xf32>
    %21 = arith.mulf %11, %20 : vector<64x128xf32>
    %cst_12 = arith.constant 1.000000e+00 : f32
    %22 = vector.broadcast %cst_12 : f32 to vector<1x128xf32>
    %23 = arith.addf %22, %3 : vector<1x128xf32>
    %24 = vector.broadcast %23 : vector<1x128xf32> to vector<64x128xf32>
    %25 = arith.mulf %21, %24 : vector<64x128xf32>
    %26 = vector.broadcast %5 : vector<1x128xf32> to vector<64x128xf32>
    %27 = arith.addf %25, %26 : vector<64x128xf32>
    %28 = arith.truncf %27 : vector<64x128xf32> to vector<64x128xbf16>
    %c0_13 = arith.constant 0 : index
    %c0_14 = arith.constant 0 : index
    %c0_15 = arith.constant 0 : index
    %29 = vector.load %arg5[%c0_13, %c0_14, %c0_15] : memref<1x64x32xf32, #tpu.memory_space<vmem>>, vector<1x64x32xf32>
    %30 = vector.shape_cast %29 : vector<1x64x32xf32> to vector<64x32xf32>
    %c0_16 = arith.constant 0 : index
    %c0_17 = arith.constant 0 : index
    %c0_18 = arith.constant 0 : index
    %31 = vector.load %arg6[%c0_16, %c0_17, %c0_18] : memref<1x64x32xf32, #tpu.memory_space<vmem>>, vector<1x64x32xf32>
    %32 = vector.shape_cast %31 : vector<1x64x32xf32> to vector<64x32xf32>
    %c0_19 = arith.constant 0 : index
    %c0_20 = arith.constant 0 : index
    %33 = vector.load %arg7[%c0_19, %c0_20] : memref<128x128xbf16, #tpu.memory_space<vmem>>, vector<128x128xbf16>
    %cst_21 = arith.constant dense<0.000000e+00> : vector<64x128xf32>
    %34 = tpu.matmul %28, %33, %cst_21 {dimension_numbers = #tpu.dot_dimension_numbers<[1], [0], [0], [1], [0, 0, 1, 1], [], []>} : vector<64x128xbf16>, vector<128x128xbf16>, vector<64x128xf32> -> vector<64x128xf32>
    %c0_22 = arith.constant 0 : index
    %c0_23 = arith.constant 0 : index
    %35 = vector.load %arg10[%c0_22, %c0_23] : memref<1x128xf32, #tpu.memory_space<vmem>>, vector<1x128xf32>
    %36 = vector.broadcast %35 : vector<1x128xf32> to vector<64x128xf32>
    %37 = arith.addf %34, %36 : vector<64x128xf32>
    %c0_24 = arith.constant 0 : index
    %c0_25 = arith.constant 0 : index
    %38 = vector.load %arg13[%c0_24, %c0_25] : memref<1x128xf32, #tpu.memory_space<vmem>>, vector<1x128xf32>
    %39 = arith.mulf %37, %37 : vector<64x128xf32>
    %cst_26 = arith.constant dense<0.000000e+00> : vector<64xf32>
    %40 = vector.multi_reduction <add>, %39, %cst_26 [1] : vector<64x128xf32> to vector<64xf32>
    %41 = vector.shape_cast %40 : vector<64xf32> to vector<64x1xf32>
    %cst_27 = arith.constant 1.280000e+02 : f32
    %42 = vector.broadcast %cst_27 : f32 to vector<64x1xf32>
    %43 = arith.divf %41, %42 : vector<64x1xf32>
    %cst_28 = arith.constant 9.99999997E-7 : f32
    %44 = vector.broadcast %cst_28 : f32 to vector<64x1xf32>
    %45 = arith.addf %43, %44 : vector<64x1xf32>
    %46 = math.rsqrt %45 : vector<64x1xf32>
    %47 = vector.broadcast %46 : vector<64x1xf32> to vector<64x128xf32>
    %48 = arith.mulf %37, %47 : vector<64x128xf32>
    %49 = vector.broadcast %38 : vector<1x128xf32> to vector<64x128xf32>
    %50 = arith.mulf %48, %49 : vector<64x128xf32>
    %51 = vector.extract_strided_slice %50 {offsets = [0, 0], sizes = [64, 32], strides = [1, 1]} : vector<64x128xf32> to vector<64x32xf32>
    %52 = vector.extract_strided_slice %50 {offsets = [0, 32], sizes = [64, 32], strides = [1, 1]} : vector<64x128xf32> to vector<64x32xf32>
    %53 = arith.mulf %51, %30 : vector<64x32xf32>
    %54 = arith.mulf %52, %32 : vector<64x32xf32>
    %55 = arith.subf %53, %54 : vector<64x32xf32>
    %56 = arith.mulf %51, %32 : vector<64x32xf32>
    %57 = arith.mulf %52, %30 : vector<64x32xf32>
    %58 = arith.addf %56, %57 : vector<64x32xf32>
    %59 = vector.extract_strided_slice %50 {offsets = [0, 64], sizes = [64, 32], strides = [1, 1]} : vector<64x128xf32> to vector<64x32xf32>
    %60 = vector.extract_strided_slice %50 {offsets = [0, 96], sizes = [64, 32], strides = [1, 1]} : vector<64x128xf32> to vector<64x32xf32>
    %61 = arith.mulf %59, %30 : vector<64x32xf32>
    %62 = arith.mulf %60, %32 : vector<64x32xf32>
    %63 = arith.subf %61, %62 : vector<64x32xf32>
    %64 = arith.mulf %59, %32 : vector<64x32xf32>
    %65 = arith.mulf %60, %30 : vector<64x32xf32>
    %66 = arith.addf %64, %65 : vector<64x32xf32>
    %67 = tpu.concatenate %55, %58, %63, %66 in 1 : vector<64x32xf32>, vector<64x32xf32>, vector<64x32xf32>, vector<64x32xf32> -> vector<64x128xf32>
    %68 = arith.truncf %67 : vector<64x128xf32> to vector<64x128xbf16>
    %c0_29 = arith.constant 0 : index
    %c0_30 = arith.constant 0 : index
    %c0_31 = arith.constant 0 : index
    %69 = vector.load %arg15[%c0_29, %c0_30, %c0_31] : memref<1x64x128xbf16, #tpu.memory_space<vmem>>, vector<1x64x128xbf16>
    %70 = vector.shape_cast %69 : vector<1x64x128xbf16> to vector<64x128xbf16>
    %71 = vector.shape_cast %68 : vector<64x128xbf16> to vector<1x64x128xbf16>
    tpu.vector_store %arg15[%c0_29, %c0_30, %c0_31], %71 {strides = array<i32>} : memref<1x64x128xbf16, #tpu.memory_space<vmem>>, vector<1x64x128xbf16>,
    %c0_32 = arith.constant 0 : index
    %c0_33 = arith.constant 0 : index
    %72 = vector.load %arg8[%c0_32, %c0_33] : memref<128x128xbf16, #tpu.memory_space<vmem>>, vector<128x128xbf16>
    %cst_34 = arith.constant dense<0.000000e+00> : vector<64x128xf32>
    %73 = tpu.matmul %28, %72, %cst_34 {dimension_numbers = #tpu.dot_dimension_numbers<[1], [0], [0], [1], [0, 0, 1, 1], [], []>} : vector<64x128xbf16>, vector<128x128xbf16>, vector<64x128xf32> -> vector<64x128xf32>
    %c0_35 = arith.constant 0 : index
    %c0_36 = arith.constant 0 : index
    %74 = vector.load %arg11[%c0_35, %c0_36] : memref<1x128xf32, #tpu.memory_space<vmem>>, vector<1x128xf32>
    %75 = vector.broadcast %74 : vector<1x128xf32> to vector<64x128xf32>
    %76 = arith.addf %73, %75 : vector<64x128xf32>
    %c0_37 = arith.constant 0 : index
    %c0_38 = arith.constant 0 : index
    %77 = vector.load %arg14[%c0_37, %c0_38] : memref<1x128xf32, #tpu.memory_space<vmem>>, vector<1x128xf32>
    %78 = arith.mulf %76, %76 : vector<64x128xf32>
    %cst_39 = arith.constant dense<0.000000e+00> : vector<64xf32>
    %79 = vector.multi_reduction <add>, %78, %cst_39 [1] : vector<64x128xf32> to vector<64xf32>
    %80 = vector.shape_cast %79 : vector<64xf32> to vector<64x1xf32>
    %cst_40 = arith.constant 1.280000e+02 : f32
    %81 = vector.broadcast %cst_40 : f32 to vector<64x1xf32>
    %82 = arith.divf %80, %81 : vector<64x1xf32>
    %cst_41 = arith.constant 9.99999997E-7 : f32
    %83 = vector.broadcast %cst_41 : f32 to vector<64x1xf32>
    %84 = arith.addf %82, %83 : vector<64x1xf32>
    %85 = math.rsqrt %84 : vector<64x1xf32>
    %86 = vector.broadcast %85 : vector<64x1xf32> to vector<64x128xf32>
    %87 = arith.mulf %76, %86 : vector<64x128xf32>
    %88 = vector.broadcast %77 : vector<1x128xf32> to vector<64x128xf32>
    %89 = arith.mulf %87, %88 : vector<64x128xf32>
    %90 = vector.extract_strided_slice %89 {offsets = [0, 0], sizes = [64, 32], strides = [1, 1]} : vector<64x128xf32> to vector<64x32xf32>
    %91 = vector.extract_strided_slice %89 {offsets = [0, 32], sizes = [64, 32], strides = [1, 1]} : vector<64x128xf32> to vector<64x32xf32>
    %92 = arith.mulf %90, %30 : vector<64x32xf32>
    %93 = arith.mulf %91, %32 : vector<64x32xf32>
    %94 = arith.subf %92, %93 : vector<64x32xf32>
    %95 = arith.mulf %90, %32 : vector<64x32xf32>
    %96 = arith.mulf %91, %30 : vector<64x32xf32>
    %97 = arith.addf %95, %96 : vector<64x32xf32>
    %98 = vector.extract_strided_slice %89 {offsets = [0, 64], sizes = [64, 32], strides = [1, 1]} : vector<64x128xf32> to vector<64x32xf32>
    %99 = vector.extract_strided_slice %89 {offsets = [0, 96], sizes = [64, 32], strides = [1, 1]} : vector<64x128xf32> to vector<64x32xf32>
    %100 = arith.mulf %98, %30 : vector<64x32xf32>
    %101 = arith.mulf %99, %32 : vector<64x32xf32>
    %102 = arith.subf %100, %101 : vector<64x32xf32>
    %103 = arith.mulf %98, %32 : vector<64x32xf32>
    %104 = arith.mulf %99, %30 : vector<64x32xf32>
    %105 = arith.addf %103, %104 : vector<64x32xf32>
    %106 = tpu.concatenate %94, %97, %102, %105 in 1 : vector<64x32xf32>, vector<64x32xf32>, vector<64x32xf32>, vector<64x32xf32> -> vector<64x128xf32>
    %107 = arith.truncf %106 : vector<64x128xf32> to vector<64x128xbf16>
    %c0_42 = arith.constant 0 : index
    %c0_43 = arith.constant 0 : index
    %c0_44 = arith.constant 0 : index
    %108 = vector.load %arg16[%c0_42, %c0_43, %c0_44] : memref<1x64x128xbf16, #tpu.memory_space<vmem>>, vector<1x64x128xbf16>
    %109 = vector.shape_cast %108 : vector<1x64x128xbf16> to vector<64x128xbf16>
    %110 = vector.shape_cast %107 : vector<64x128xbf16> to vector<1x64x128xbf16>
    tpu.vector_store %arg16[%c0_42, %c0_43, %c0_44], %110 {strides = array<i32>} : memref<1x64x128xbf16, #tpu.memory_space<vmem>>, vector<1x64x128xbf16>,
    %c0_45 = arith.constant 0 : index
    %c0_46 = arith.constant 0 : index
    %111 = vector.load %arg9[%c0_45, %c0_46] : memref<128x128xbf16, #tpu.memory_space<vmem>>, vector<128x128xbf16>
    %cst_47 = arith.constant dense<0.000000e+00> : vector<64x128xf32>
    %112 = tpu.matmul %28, %111, %cst_47 {dimension_numbers = #tpu.dot_dimension_numbers<[1], [0], [0], [1], [0, 0, 1, 1], [], []>} : vector<64x128xbf16>, vector<128x128xbf16>, vector<64x128xf32> -> vector<64x128xf32>
    %c0_48 = arith.constant 0 : index
    %c0_49 = arith.constant 0 : index
    %113 = vector.load %arg12[%c0_48, %c0_49] : memref<1x128xf32, #tpu.memory_space<vmem>>, vector<1x128xf32>
    %114 = vector.broadcast %113 : vector<1x128xf32> to vector<64x128xf32>
    %115 = arith.addf %112, %114 : vector<64x128xf32>
    %116 = arith.truncf %115 : vector<64x128xf32> to vector<64x128xbf16>
    %c0_50 = arith.constant 0 : index
    %c0_51 = arith.constant 0 : index
    %c0_52 = arith.constant 0 : index
    %117 = vector.load %arg17[%c0_50, %c0_51, %c0_52] : memref<1x64x128xbf16, #tpu.memory_space<vmem>>, vector<1x64x128xbf16>
    %118 = vector.shape_cast %117 : vector<1x64x128xbf16> to vector<64x128xbf16>
    %119 = vector.shape_cast %116 : vector<64x128xbf16> to vector<1x64x128xbf16>
    tpu.vector_store %arg17[%c0_50, %c0_51, %c0_52], %119 {strides = array<i32>} : memref<1x64x128xbf16, #tpu.memory_space<vmem>>, vector<1x64x128xbf16>,
    return
  }
  func.func @transform_0(%arg0: i32, %arg1: i32) -> (i32, i32, i32) {
    %c0_i32 = arith.constant 0 : i32
    %c0_i32_0 = arith.constant 0 : i32
    return %arg0, %arg1, %c0_i32 : i32, i32, i32
  }
  func.func @transform_1(%arg0: i32, %arg1: i32) -> (i32, i32, i32) {
    %c0_i32 = arith.constant 0 : i32
    %c0_i32_0 = arith.constant 0 : i32
    %c0_i32_1 = arith.constant 0 : i32
    return %arg0, %c0_i32, %c0_i32_0 : i32, i32, i32
  }
  func.func @transform_2(%arg0: i32, %arg1: i32) -> (i32, i32, i32) {
    %c0_i32 = arith.constant 0 : i32
    %c0_i32_0 = arith.constant 0 : i32
    %c0_i32_1 = arith.constant 0 : i32
    return %arg0, %c0_i32, %c0_i32_0 : i32, i32, i32
  }
  func.func @transform_3(%arg0: i32, %arg1: i32) -> (i32, i32, i32) {
    %c0_i32 = arith.constant 0 : i32
    %c0_i32_0 = arith.constant 0 : i32
    return %arg0, %arg1, %c0_i32 : i32, i32, i32
  }
  func.func @transform_4(%arg0: i32, %arg1: i32) -> (i32, i32, i32) {
    %c0_i32 = arith.constant 0 : i32
    %c0_i32_0 = arith.constant 0 : i32
    return %arg0, %arg1, %c0_i32 : i32, i32, i32
  }
  func.func @transform_5(%arg0: i32, %arg1: i32) -> (i32, i32) {
    %c0_i32 = arith.constant 0 : i32
    %c0_i32_0 = arith.constant 0 : i32
    %c0_i32_1 = arith.constant 0 : i32
    return %c0_i32, %c0_i32_0 : i32, i32
  }
  func.func @transform_6(%arg0: i32, %arg1: i32) -> (i32, i32) {
    %c0_i32 = arith.constant 0 : i32
    %c0_i32_0 = arith.constant 0 : i32
    %c0_i32_1 = arith.constant 0 : i32
    return %c0_i32, %c0_i32_0 : i32, i32
  }
  func.func @transform_7(%arg0: i32, %arg1: i32) -> (i32, i32) {
    %c0_i32 = arith.constant 0 : i32
    %c0_i32_0 = arith.constant 0 : i32
    %c0_i32_1 = arith.constant 0 : i32
    return %c0_i32, %c0_i32_0 : i32, i32
  }
  func.func @transform_8(%arg0: i32, %arg1: i32) -> (i32, i32) {
    %c0_i32 = arith.constant 0 : i32
    %c0_i32_0 = arith.constant 0 : i32
    %c0_i32_1 = arith.constant 0 : i32
    return %c0_i32, %c0_i32_0 : i32, i32
  }
  func.func @transform_9(%arg0: i32, %arg1: i32) -> (i32, i32) {
    %c0_i32 = arith.constant 0 : i32
    %c0_i32_0 = arith.constant 0 : i32
    %c0_i32_1 = arith.constant 0 : i32
    return %c0_i32, %c0_i32_0 : i32, i32
  }
  func.func @transform_10(%arg0: i32, %arg1: i32) -> (i32, i32) {
    %c0_i32 = arith.constant 0 : i32
    %c0_i32_0 = arith.constant 0 : i32
    %c0_i32_1 = arith.constant 0 : i32
    return %c0_i32, %c0_i32_0 : i32, i32
  }
  func.func @transform_11(%arg0: i32, %arg1: i32) -> (i32, i32) {
    %c0_i32 = arith.constant 0 : i32
    %c0_i32_0 = arith.constant 0 : i32
    %c0_i32_1 = arith.constant 0 : i32
    return %c0_i32, %c0_i32_0 : i32, i32
  }
  func.func @transform_12(%arg0: i32, %arg1: i32) -> (i32, i32) {
    %c0_i32 = arith.constant 0 : i32
    %c0_i32_0 = arith.constant 0 : i32
    %c0_i32_1 = arith.constant 0 : i32
    return %c0_i32, %c0_i32_0 : i32, i32
  }
  func.func @transform_13(%arg0: i32, %arg1: i32) -> (i32, i32, i32) {
    %c0_i32 = arith.constant 0 : i32
    %c0_i32_0 = arith.constant 0 : i32
    return %arg0, %arg1, %c0_i32 : i32, i32, i32
  }
  func.func @transform_14(%arg0: i32, %arg1: i32) -> (i32, i32, i32) {
    %c0_i32 = arith.constant 0 : i32
    %c0_i32_0 = arith.constant 0 : i32
    return %arg0, %arg1, %c0_i32 : i32, i32, i32
  }
  func.func @transform_15(%arg0: i32, %arg1: i32) -> (i32, i32, i32) {
    %c0_i32 = arith.constant 0 : i32
    %c0_i32_0 = arith.constant 0 : i32
    return %arg0, %arg1, %c0_i32 : i32, i32, i32
  }
}

</mosaic_0001>

<bundles_post_ra>
// kernel: tpu_custom_call.1
= control target key start
LH: loop header
LB: loop body
LE: loop exit
PB: predicated region body
PF: predicated region fallthrough
CT: control target
= control target key end

     0   :  { %s5106_s0 = inlined_call_operand.vmem [shape: f32[2,64,128], index: 0, kind: input, shape index: {}]   ;;  %s5107_s1 = inlined_call_operand.hbm [shape: f32[2,1,128], index: 1, kind: input, shape index: {}]   ;;  %s5108_s2 = inlined_call_operand.hbm [shape: f32[2,1,128], index: 2, kind: input, shape index: {}]   ;;  %s5109_s3 = inlined_call_operand.vmem [shape: f32[2,64,32], index: 3, kind: input, shape index: {}]   ;;  %s5110_s4 = inlined_call_operand.vmem [shape: f32[2,64,32], index: 4, kind: input, shape index: {}]   ;;  %s5111_s5 = inlined_call_operand.vmem [shape: bf16[128,128], index: 5, kind: input, shape index: {}]   ;;  %s5112_s6 = inlined_call_operand.vmem [shape: bf16[128,128], index: 6, kind: input, shape index: {}]   ;;  %s5113_s7 = inlined_call_operand.vmem [shape: bf16[128,128], index: 7, kind: input, shape index: {}]   ;;  %s5114_s8 = inlined_call_operand.vmem [shape: f32[1,128], index: 8, kind: input, shape index: {}]   ;;  %s5115_s9 = inlined_call_operand.vmem [shape: f32[1,128], index: 9, kind: input, shape index: {}]   ;;  %s5116_s10 = inlined_call_operand.vmem [shape: f32[1,128], index: 10, kind: input, shape index: {}]   ;;  %s5117_s11 = inlined_call_operand.vmem [shape: f32[1,128], index: 11, kind: input, shape index: {}]   ;;  %s5118_s12 = inlined_call_operand.vmem [shape: f32[1,128], index: 12, kind: input, shape index: {}]   ;;  %s5119_s13 = inlined_call_operand.hbm [shape: bf16[2,64,128], index: 13, kind: output, shape index: {0}]   ;;  %s5120_s14 = inlined_call_operand.hbm [shape: bf16[2,64,128], index: 14, kind: output, shape index: {1}]   ;;  %s5121_s15 = inlined_call_operand.hbm [shape: bf16[2,64,128], index: 15, kind: output, shape index: {2}]  }
   0x1   :  { %5184 = sst [smem:[#allocation46_spill]] %s5106_s0 }
   0x2   :  { %5185 = sst [smem:[#allocation47_spill]] %s5107_s1 }
   0x3   :  { %5186 = sst [smem:[#allocation48_spill]] %s5108_s2 }
   0x4   :  { %5187 = sst [smem:[#allocation49_spill]] %s5117_s11 }
   0x5   :  { %5188 = sst [smem:[#allocation50_spill]] %s5119_s13 }
   0x6   :  { %5189 = sst [smem:[#allocation51_spill]] %s5120_s14 }
   0x7   :  { %5190 = sst [smem:[#allocation52_spill]] %s5121_s15 }
   0x8   :  { %21 = vsyncpa [#allocation3], 0 }
   0x9   :  { %23 = vsyncpa [#allocation3 + $0x1], 0 }
   0xa   :  { %24 = vsyncpa [#allocation6], 0 }
   0xb   :  { %26 = vsyncpa [#allocation6 + $0x1], 0 }
   0xc   :  { %27 = vsyncpa [#allocation4], 0 }
   0xd   :  { %29 = vsyncpa [#allocation4 + $0x1], 0 }
   0xe   :  { %30 = vsyncpa [#allocation9], 0 }
   0xf   :  { %32 = vsyncpa [#allocation9 + $0x1], 0  ;;  %s3359_s18 = smov 0   ;;  %s3361_s19 = smov 0  }
  0x10   :  { %s3363_s20 = smov 0   ;;  %s3365_s21 = smov 0  }
  0x11   :  { %s3367_s22 = smov 0   ;;  %s3369_s23 = smov 0  }
  0x12 LB: > { %5191 = sst [smem:[#allocation15_spill]] %s3252_s18  ;;  %s3390_s24 = sadd.s32 4294967295, %s3272_s23   ;;  %s3272_s23 = sphi %s3369_s23, %s38_s23   ;;  %s3268_s22 = sphi %s3367_s22, %s5349_s22   ;;  %s3264_s21 = sphi %s3365_s21, %s5348_s21   ;;  %s3260_s20 = sphi %s3363_s20, %s5344_s20   ;;  %s3256_s19 = sphi %s3361_s19, %s5347_s19   ;;  %s3252_s18 = sphi %s3359_s18, %s5346_s18  }
  0x13   : > { %5192 = sst [smem:[#allocation16_spill]] %s3260_s20  ;;  %s5128_s25 = sadd.s32 4294967294, %s3272_s23  }
  0x14   : > { %5193 = sst [smem:[#allocation17_spill]] %s3390_s24  ;;  %s50_s26 = sadd.s32 1, %s3268_s22 }
  0x15   : > { %s85_s27 = sadd.s32 1, %s3260_s20  ;;  %p52_p0 = scmp.ge.s32.totalorder %s50_s26, 2 }
  0x16   : > { %p92_p1 = scmp.ne.s32.totalorder %s3260_s20, %s3256_s19  ;;  %p93_p2 = scmp.eq.s32.totalorder %s3272_s23, 0 }
  0x17   : > { %p98_p3 = scmp.ne.s32.totalorder %s3256_s19, %s3252_s18  ;;  %s5351_s26 = smov (%p52_p0, %s50_s26), 0 }
  0x18   : > { %5194 = sst [smem:[#allocation18_spill]] %s5351_s26  ;;  %p3402_p4 = por %p93_p2, %p92_p1 }
  0x19   : > { %p99_p5 = scmp.eq.s32.totalorder %s3390_s24, 0  ;;  %s82_s29 = ssub.s32 %s3268_s22, %s5351_s26 }
  0x1a   : > { %p374_p6 = scmp.eq.s32.totalorder %s3390_s24, 1  ;;  %p83_p7 = scmp.eq.s32.totalorder %s82_s29, 0 }
  0x1b   : > { %p3410_p8 = por %p99_p5, %p98_p3  ;;  %p380_p10 = scmp.eq.s32.totalorder %s5128_s25, 1 }
  0x1c   : > { %p3414_p9 = por %p374_p6, %p92_p1  ;;  %p2607_p12 = scmp.ge.s32.totalorder %s3272_s23, 2 }
  0x1d   : > { %s3421_s17 = scalar_select %p83_p7, %s3260_s20, %s85_s27  }
  0x1e   : > { %s5197_s16 = scalar_select %p3414_p9, 1, 0 }
  0x1f   : > { %5199 = sst [smem:[#allocation20_spill]] %s3421_s17  ;;  %p3423_p11 = por %p380_p10, %p98_p3 }
  0x20   : > { %5198 = sst [smem:[#allocation19_spill]] %s5197_s16  ;;  %p2859_p13 = scmp.lt.s32.totalorder %s3272_s23, 2 }
  0x21   : > { %s5200_s18 = scalar_select %p3423_p11, 1, 0 }
  0x22   : > { %s493_s29 = sand.u32 1, %s3260_s20   ;;  %s5202_s1 = sld [smem:[#allocation47_spill]] }
  0x23   : > { %5201 = sst [smem:[#allocation21_spill]] %s5200_s18  ;;  %s496_s24 = scalar_lea.vmem [#allocation2], %s493_s29 }
  0x24   : > { %s503_s13 = sshll.u32 %s496_s24, 4  ;;  %p2843_p0 = pnand %p2859_p13, %p3402_p4  ;;  %s504_s13 = int_to_ptr.vmem [resolvable:$true] %s503_s13 }
  0x25   : > { %p2608_p1 = scmp.ge.s32.totalorder %s3272_s23, 1  ;;  %p551_p2 = scmp.lt.s32.totalorder %s3272_s23, 3 }
  0x26   : > { %s494_s27 = scalar_lea.sflag [#allocation3], %s493_s29  ;;  %s5203_s2 = sld [smem:[#allocation48_spill]] }
  0x27   : > { %p552_p3 = pnand %p2608_p1, %p551_p2  ;;  %s513_s18 = scalar_lea.vmem [#allocation5], %s493_s29 }
  0x28   : > { %s499_s14 = scalar_lea.hbm %s5202_s1, %s3268_s22  ;;  %s520_s16 = sshll.u32 %s513_s18, 4  ;;  %s521_s16 = int_to_ptr.vmem [resolvable:$true] %s520_s16 }
  0x29   : > { %s501_s11 = sshll.u32 %s499_s14, 4  ;;  %s511_s24 = scalar_lea.sflag [#allocation6], %s493_s29  ;;  %s502_s11 = int_to_ptr.hbm [resolvable:$true] %s501_s11 }
  0x2a   : > { %2845 = dma.hbm_to_vmem [thread:$0]  (!%p2843_p0), %s502_s11, 16, %s504_s13, %s494_s27  }
  0x2b   : > { %555 = sbr.rel (%p552_p3) target bundleno = 1058 (0x422), region = 72 }
  0x2c   : > { %s516_s20 = scalar_lea.hbm %s5203_s2, %s3268_s22 }
  0x2d   : > { %s518_s15 = sshll.u32 %s516_s20, 4  ;;  %s519_s15 = int_to_ptr.hbm [resolvable:$true] %s518_s15 }
  0x2e   : > { %2848 = dma.hbm_to_vmem [thread:$0]  (!%p2843_p0), %s519_s15, 16, %s521_s16, %s511_s24  }
  0x30   : > { %s3443_s14 = sand.u32 1, %s3256_s19  }
  0x31   : > { %s558_s11 = scalar_lea.sflag [#allocation3], %s3443_s14  ;;  %s560_s13 = scalar_lea.vmem [#allocation2], %s3443_s14 }
  0x32   : > { %3235 = dma.done.wait (%p3410_p8), %s558_s11, 16  }
  0x33   : > { %3237 = vsyncadd (%p3410_p8), %s558_s11, 4294967280  ;;  %s567_s18 = scalar_lea.sflag [#allocation6], %s3443_s14  ;;  %s569_s20 = scalar_lea.vmem [#allocation5], %s3443_s14 }
  0x34   : > { %3239 = dma.done.wait (%p3410_p8), %s567_s18, 16  }
  0x35   : > { %3241 = vsyncadd (%p3410_p8), %s567_s18, 4294967280  ;;  %p658_p4 = scmp.lt.s32.totalorder %s3264_s21, 1  ;;  %s5204_s0 = sld [smem:[#allocation46_spill]]  ;;  %v3277_v24 = vmov 128.0  }
  0x36   : > { %s5135_s15 = smov 32   ;;  %3000 = vrcp.f32 %v3277_v24  ;;  %s3928_s11 = sshll.u32 %s3443_s14, 5 }
  0x37   : > { %s659_s25 = scalar_select %p658_p4, %s3264_s21, 1 }
  0x38   : > { %s3938_s28 = scalar_lea.vmem [#allocation10], %s3928_s11 }
  0x39   : > { %s3459_s26 = sshll.u32 %s659_s25, 6  ;;  %s5133_s25 = smov 64  }
  0x3a   : > { %s3493_s27 = scalar_lea.vmem %s5110_s4, %s3459_s26  ;;  %s3534_s18 = scalar_lea.vmem %s5109_s3, %s3459_s26 }
  0x3b   : > { %s665_s17 = scalar_lea.vmem %s5204_s0, %s3459_s26  ;;  %v3496_v8 = vld [vmem:[%s3493_s27 + $0x10] sm:$0xff]  ;;  %v3501_v9 = vld [vmem:[%s3493_s27] sm:$0xff]  ;;  %v3509_v11 = vld [vmem:[%s3493_s27 + $0x8] sm:$0xff]  ;;  %s5137_s26 = smov 96  }
  0x3c   : > { %v3465_v0 = vld [vmem:[%s665_s17 + $0x20] sm:$0xff]  ;;  %v3467_v1 = vld [vmem:[%s665_s17 + $0x10] sm:$0xff]  ;;  %v3474_v3 = vld [vmem:[%s665_s17 + $0x28] sm:$0xff]  ;;  %v3001_v25 = vpop.eup %3000 }
  0x3d   : > { %v3469_v2 = vld [vmem:[%s665_s17] sm:$0xff]  ;;  %708 = vadd.xlane.f32.xlu2 %v3465_v0  ;;  %704 = vadd.xlane.f32.xlu1 %v3467_v1  ;;  %v3476_v4 = vld [vmem:[%s665_s17 + $0x18] sm:$0xff]  ;;  %v3478_v5 = vld [vmem:[%s665_s17 + $0x8] sm:$0xff]  ;;  %v717_v26 = vmul.f32 128.0, %v3001_v25  ;;  %vm721_vm0 = vweird.f32 %v3001_v25 }
  0x3e   : > { %700 = vadd.xlane.f32.xlu0 %v3469_v2  ;;  %v3483_v6 = vld [vmem:[%s665_s17 + $0x38] sm:$0xff]  ;;  %v3485_v7 = vld [vmem:[%s665_s17 + $0x30] sm:$0xff]  ;;  %v3506_v10 = vld [vmem:[%s3493_s27 + $0x20] sm:$0xff] }
  0x3f   : > { %v3516_v12 = vld [vmem:[%s3493_s27 + $0x18] sm:$0xff]  ;;  %v3524_v14 = vld [vmem:[%s3493_s27 + $0x28] sm:$0xff]  ;;  %v3537_v15 = vld [vmem:[%s3493_s27 + $0x30] sm:$0xff]  ;;  %v718_v27 = vsub.f32 1.0, %v717_v26 }
  0x40   : > { %v3521_v13 = vld [vmem:[%s3493_s27 + $0x38] sm:$0xff]  ;;  %v3542_v16 = vld [vmem:[%s3534_s18] sm:$0xff]  ;;  %v3545_v17 = vld [vmem:[%s3534_s18 + $0x8] sm:$0xff] }
  0x41   : > { %v3552_v18 = vld [vmem:[%s3534_s18 + $0x10] sm:$0xff]  ;;  %v3557_v19 = vld [vmem:[%s3534_s18 + $0x18] sm:$0xff]  ;;  %v3560_v20 = vld [vmem:[%s3534_s18 + $0x20] sm:$0xff]  ;;  %v719_v29 = vmul.f32 %v3001_v25, %v718_v27 }
  0x42   : > { %v3567_v21 = vld [vmem:[%s3534_s18 + $0x28] sm:$0xff]  ;;  %v3572_v22 = vld [vmem:[%s3534_s18 + $0x30] sm:$0xff]  ;;  %v3575_v23 = vld [vmem:[%s3534_s18 + $0x38] sm:$0xff] }
  0x43   : > { %v720_v31 = vadd.f32 %v3001_v25, %v719_v29  ;;  %v2741_v29 = vld [vmem:[%s5112_s6 + $0x28] sm:$0xff] }
  0x45   : > { %710 = vadd.xlane.f32.xlu2 %v3474_v3  ;;  %706 = vadd.xlane.f32.xlu1 %v3476_v4  ;;  %v3607_v33 = vsel %vm721_vm0, %v3001_v25, %v720_v31  ;;  %v2732_v31 = vld [vmem:[%s5111_s5 + $0x20] sm:$0xff] }
  0x46   : > { %702 = vadd.xlane.f32.xlu0 %v3478_v5 }
  0x4d   : > { %714 = vadd.xlane.f32.xlu1 %v3483_v6 }
  0x4e   : > { %712 = vadd.xlane.f32.xlu0 %v3485_v7 }
  0x5d   : > { %1167 = vrot.lane.b32.xlu2 %v3496_v8, %s5135_s15 }
  0x62   : > { %1163 = vrot.lane.b32.xlu0 %v3501_v9, %s5135_s15 }
  0x65   : > { %1171 = vrot.lane.b32.xlu2 %v3506_v10, %s5135_s15 }
  0x66   : > { %1165 = vrot.lane.b32.xlu1 %v3509_v11, %s5135_s15 }
  0x6a   : > { %1169 = vrot.lane.b32.xlu0 %v3516_v12, %s5135_s15 }
  0x6d   : > { %1177 = vrot.lane.b32.xlu2 %v3521_v13, %s5135_s15 }
  0x6e   : > { %1173 = vrot.lane.b32.xlu1 %v3524_v14, %s5135_s15 }
  0x72   : > { %1175 = vrot.lane.b32.xlu0 %v3537_v15, %s5135_s15 }
  0x75   : > { %1251 = vrot.lane.b32.xlu2 %v3542_v16, %s5135_s15 }
  0x76   : > { %1253 = vrot.lane.b32.xlu1 %v3545_v17, %s5135_s15 }
  0x7a   : > { %1255 = vrot.lane.b32.xlu0 %v3552_v18, %s5135_s15 }
  0x7d   : > { %1257 = vrot.lane.b32.xlu2 %v3557_v19, %s5135_s15 }
  0x7e   : > { %1259 = vrot.lane.b32.xlu1 %v3560_v20, %s5135_s15 }
  0x82   : > { %1261 = vrot.lane.b32.xlu0 %v3567_v21, %s5135_s15 }
  0x85   : > { %1263 = vrot.lane.b32.xlu2 %v3572_v22, %s5135_s15 }
  0x86   : > { %1265 = vrot.lane.b32.xlu1 %v3575_v23, %s5135_s15  ;;  %s5249_s15 = smov 32  }
  0x8a   : > { %1325 = vrot.lane.b32.xlu0 %v3545_v17, %s5133_s25 }
  0x8d   : > { %1327 = vrot.lane.b32.xlu2 %v3552_v18, %s5133_s25 }
  0x8e   : > { %1323 = vrot.lane.b32.xlu1 %v3542_v16, %s5133_s25 }
  0x92   : > { %1331 = vrot.lane.b32.xlu0 %v3560_v20, %s5133_s25 }
  0x95   : > { %1333 = vrot.lane.b32.xlu2 %v3567_v21, %s5133_s25 }
  0x96   : > { %1329 = vrot.lane.b32.xlu1 %v3557_v19, %s5133_s25 }
  0x9a   : > { %1337 = vrot.lane.b32.xlu0 %v3575_v23, %s5133_s25 }
  0x9d   : > { %1355 = vrot.lane.b32.xlu2 %v3501_v9, %s5137_s26 }
  0x9e   : > { %1335 = vrot.lane.b32.xlu1 %v3572_v22, %s5133_s25 }
  0xa2   : > { %1359 = vrot.lane.b32.xlu0 %v3496_v8, %s5137_s26 }
  0xa5   : > { %1361 = vrot.lane.b32.xlu2 %v3516_v12, %s5137_s26 }
  0xa6   : > { %1357 = vrot.lane.b32.xlu1 %v3509_v11, %s5137_s26 }
  0xae   : > { %1363 = vrot.lane.b32.xlu1 %v3506_v10, %s5137_s26 }
  0xb0   : > { %v705_v30 = vpop.xlane.xlu1 %704  ;;  %v709_v38 = vpop.xlane.xlu2 %708 }
  0xb1   : > { %v701_v28 = vpop.xlane.xlu0 %700  ;;  %v727_v40 = vmul.f32 %v3607_v33, %v709_v38  ;;  %v725_v45 = vmul.f32 %v3607_v33, %v705_v30  ;;  %v2749_v30 = vld [vmem:[%s5113_s7 + $0x28] sm:$0xff]  ;;  %v2731_v38 = vld [vmem:[%s5111_s5 + $0x18] sm:$0xff] }
  0xb2   : > { %v723_v36 = vmul.f32 %v3607_v33, %v701_v28  ;;  %v2733_v28 = vld [vmem:[%s5111_s5 + $0x28] sm:$0xff] }
  0xb3   : > { %v3625_v46 = vsub.f32 %v3465_v0, %v727_v40  ;;  %v3636_v52 = vsub.f32 %v3467_v1, %v725_v45  ;;  %v2739_v40 = vld [vmem:[%s5112_s6 + $0x18] sm:$0xff] }
  0xb4   : > { %v3615_v39 = vsub.f32 %v3469_v2, %v723_v36 }
  0xb5   : > { %v743_v50 = vmul.f32 %v3625_v46, %v3625_v46  ;;  %v741_v57 = vmul.f32 %v3636_v52, %v3636_v52 }
  0xb6   : > { %v739_v43 = vmul.f32 %v3615_v39, %v3615_v39 }
  0xb8   : > { %v707_v35 = vpop.xlane.xlu1 %706  ;;  %v711_v53 = vpop.xlane.xlu2 %710 }
  0xb9   : > { %v703_v32 = vpop.xlane.xlu0 %702  ;;  %v726_v42 = vmul.f32 %v3607_v33, %v707_v35  ;;  %v728_v56 = vmul.f32 %v3607_v33, %v711_v53  ;;  %v2745_v53 = vld [vmem:[%s5113_s7 + $0x8] sm:$0xff] }
  0xba   : > { %v724_v34 = vmul.f32 %v3607_v33, %v703_v32  ;;  %v2740_v32 = vld [vmem:[%s5112_s6 + $0x20] sm:$0xff] }
  0xbb   : > { %v3628_v47 = vsub.f32 %v3476_v4, %v726_v42  ;;  %v3651_v60 = vsub.f32 %v3474_v3, %v728_v56  ;;  %v2730_v42 = vld [vmem:[%s5111_s5 + $0x10] sm:$0xff]  ;;  %v2736_v56 = vld [vmem:[%s5112_s6] sm:$0xff] }
  0xbc   : > { %v3612_v37 = vsub.f32 %v3478_v5, %v724_v34  ;;  %v2748_v34 = vld [vmem:[%s5113_s7 + $0x20] sm:$0xff] }
  0xbd   : > { %v742_v51 = vmul.f32 %v3628_v47, %v3628_v47  ;;  %v744_v62 = vmul.f32 %v3651_v60, %v3651_v60 }
  0xbe   : > { %v740_v41 = vmul.f32 %v3612_v37, %v3612_v37 }
  0xc0   : > { %v715_v44 = vpop.xlane.xlu1 %714  ;;  %v3657_v63 = vpop.permute.xlu2 %1167 }
  0xc1   : > { %v730_v48 = vmul.f32 %v3607_v33, %v715_v44  ;;  %v713_v49 = vpop.xlane.xlu0 %712  ;;  %v2746_v44 = vld [vmem:[%s5113_s7 + $0x10] sm:$0xff] }
  0xc2   : > { %v729_v54 = vmul.f32 %v3607_v33, %v713_v49 }
  0xc3   : > { %v3640_v55 = vsub.f32 %v3483_v6, %v730_v48 }
  0xc4   : > { %v3648_v59 = vsub.f32 %v3485_v7, %v729_v54  ;;  %v2728_v54 = vld [vmem:[%s5111_s5] sm:$0xff] }
  0xc5   : > { %v746_v58 = vmul.f32 %v3640_v55, %v3640_v55 }
  0xc6   : > { %v745_v61 = vmul.f32 %v3648_v59, %v3648_v59 }
  0xc8   : > { %v3661_v1 = vpop.permute.xlu2 %1171 }
  0xcc   : > { %749 = vadd.xlane.f32.xlu0 %v740_v41  ;;  %v2747_v41 = vld [vmem:[%s5113_s7 + $0x18] sm:$0xff] }
  0xce   : > { %747 = vadd.xlane.f32.xlu2 %v739_v43  ;;  %v2738_v43 = vld [vmem:[%s5112_s6 + $0x10] sm:$0xff] }
  0xd0   : > { %v3669_v4 = vpop.permute.xlu2 %1177 }
  0xd1   : > { %5205 = vst [vmem:[#allocation22_spill] sm:$0xff] %v3669_v4 }
  0xd4   : > { %755 = vadd.xlane.f32.xlu0 %v743_v50  ;;  %v3659_v0 = vpop.permute.xlu0 %1163  ;;  %v2729_v50 = vld [vmem:[%s5111_s5 + $0x8] sm:$0xff] }
  0xd6   : > { %753 = vadd.xlane.f32.xlu2 %v742_v51  ;;  %v2737_v51 = vld [vmem:[%s5112_s6 + $0x8] sm:$0xff] }
  0xd8   : > { %751 = vadd.xlane.f32.xlu1 %v741_v57  ;;  %v3663_v2 = vpop.permute.xlu1 %1165  ;;  %v3681_v7 = vpop.permute.xlu2 %1251  ;;  %v2744_v57 = vld [vmem:[%s5113_s7] sm:$0xff] }
  0xdc   : > { %761 = vadd.xlane.f32.xlu0 %v746_v58  ;;  %v3667_v3 = vpop.permute.xlu0 %1169 }
  0xde   : > { %759 = vadd.xlane.f32.xlu2 %v745_v61 }
  0xe0   : > { %757 = vadd.xlane.f32.xlu1 %v744_v62  ;;  %v3671_v5 = vpop.permute.xlu1 %1173 }
  0xe4   : > { %v3679_v6 = vpop.permute.xlu0 %1175 }
  0xe8   : > { %v3683_v24 = vpop.permute.xlu1 %1253 }
  0xec   : > { %v3691_v25 = vpop.permute.xlu0 %1255 }
  0xf0   : > { %1365 = vrot.lane.b32.xlu0 %v3524_v14, %s5137_s26  ;;  %v3697_v26 = vpop.permute.xlu1 %1259 }
  0xf6   : > { %1367 = vrot.lane.b32.xlu2 %v3537_v15, %s5137_s26 }
  0xf8   : > { %1429 = vrot.lane.b32.xlu0 %v3509_v11, %s5133_s25  ;;  %v3695_v11 = vpop.permute.xlu2 %1257 }
  0xf9   : > { %1369 = vrot.lane.b32.xlu1 %v3521_v13, %s5137_s26 }
  0xfe   : > { %1431 = vrot.lane.b32.xlu2 %v3496_v8, %s5133_s25  ;;  %v3705_v8 = vpop.permute.xlu0 %1261 }
 0x100   : > { %1435 = vrot.lane.b32.xlu0 %v3506_v10, %s5133_s25  ;;  %v3711_v10 = vpop.permute.xlu1 %1265 }
 0x101   : > { %1427 = vrot.lane.b32.xlu1 %v3501_v9, %s5133_s25  ;;  %v3709_v9 = vpop.permute.xlu2 %1263  ;;  %5206 = vst [vmem:[#allocation23_spill] sm:$0xff] %v3711_v10 }
 0x106   : > { %1437 = vrot.lane.b32.xlu2 %v3524_v14, %s5133_s25 }
 0x108   : > { %1441 = vrot.lane.b32.xlu0 %v3521_v13, %s5133_s25  ;;  %v3725_v14 = vpop.permute.xlu1 %1323 }
 0x109   : > { %1433 = vrot.lane.b32.xlu1 %v3516_v12, %s5133_s25  ;;  %v3719_v12 = vpop.permute.xlu0 %1325  ;;  %v3723_v13 = vpop.permute.xlu2 %1327 }
 0x10a   : > { %5207 = vst [vmem:[#allocation24_spill] sm:$0xff] %v3723_v13 }
 0x10e   : > { %1459 = vrot.lane.b32.xlu2 %v3542_v16, %s5137_s26  ;;  %v2743_v16 = vld [vmem:[%s5112_s6 + $0x38] sm:$0xff] }
 0x10f   : > { %1706 = vmatpush.bf16.msra.mxu1 %v2743_v16 }
 0x110   : > { %1463 = vrot.lane.b32.xlu0 %v3552_v18, %s5137_s26  ;;  %v2751_v18 = vld [vmem:[%s5113_s7 + $0x38] sm:$0xff] }
 0x111   : > { %1439 = vrot.lane.b32.xlu1 %v3537_v15, %s5133_s25  ;;  %v2735_v15 = vld [vmem:[%s5111_s5 + $0x38] sm:$0xff]  ;;  %2271 = vmatpush.bf16.msra.mxu2 %v2751_v18  ;;  %v3751_v27 = vpop.permute.xlu2 %1333 }
 0x112   : > { %978 = vmatpush.bf16.msra.mxu0 %v2735_v15  ;;  %2824 = vmatpush.bf16.msra.mxu3 %v2735_v15  ;;  %5209 = vst [vmem:[#allocation26_spill] sm:$0xff] %v3751_v27 }
 0x116   : > { %1465 = vrot.lane.b32.xlu2 %v3557_v19, %s5137_s26  ;;  %v2734_v19 = vld [vmem:[%s5111_s5 + $0x30] sm:$0xff] }
 0x117   : > { %979 = vmatpush.bf16.msra.mxu0 %v2734_v19  ;;  %2825 = vmatpush.bf16.msra.mxu3 %v2734_v19 }
 0x118   : > { %1469 = vrot.lane.b32.xlu0 %v3567_v21, %s5137_s26  ;;  %v2742_v21 = vld [vmem:[%s5112_s6 + $0x30] sm:$0xff] }
 0x119   : > { %1461 = vrot.lane.b32.xlu1 %v3545_v17, %s5137_s26  ;;  %v3740_v17 = vpop.permute.xlu0 %1331  ;;  %1707 = vmatpush.bf16.msra.mxu1 %v2742_v21 }
 0x11a   : > { %5208 = vst [vmem:[#allocation25_spill] sm:$0xff] %v3740_v17 }
 0x11b   : > { %980 = vmatpush.bf16.msra.mxu0 %v2733_v28  ;;  %2826 = vmatpush.bf16.msra.mxu3 %v2733_v28 }
 0x11d   : > { %1708 = vmatpush.bf16.msra.mxu1 %v2741_v29 }
 0x11e   : > { %1471 = vrot.lane.b32.xlu2 %v3572_v22, %s5137_s26  ;;  %v2750_v22 = vld [vmem:[%s5113_s7 + $0x30] sm:$0xff] }
 0x11f   : > { %2272 = vmatpush.bf16.msra.mxu2 %v2750_v22  ;;  %981 = vmatpush.bf16.msra.mxu0 %v2732_v31 }
 0x120   : > { %2827 = vmatpush.bf16.msra.mxu3 %v2732_v31 }
 0x121   : > { %1467 = vrot.lane.b32.xlu1 %v3560_v20, %s5137_s26  ;;  %v3753_v20 = vpop.permute.xlu1 %1329  ;;  %v3775_v35 = vpop.permute.xlu0 %1337  ;;  %1709 = vmatpush.bf16.msra.mxu1 %v2740_v32 }
 0x122   : > { %5210 = vst [vmem:[#allocation27_spill] sm:$0xff] %v3753_v20 }
 0x123   : > { %2273 = vmatpush.bf16.msra.mxu2 %v2749_v30  ;;  %5211 = vst [vmem:[#allocation28_spill] sm:$0xff] %v3775_v35  ;;  %982 = vmatpush.bf16.msra.mxu0 %v2731_v38 }
 0x124   : > { %2828 = vmatpush.bf16.msra.mxu3 %v2731_v38 }
 0x125   : > { %1710 = vmatpush.bf16.msra.mxu1 %v2739_v40 }
 0x127   : > { %2274 = vmatpush.bf16.msra.mxu2 %v2748_v34  ;;  %983 = vmatpush.bf16.msra.mxu0 %v2730_v42 }
 0x128   : > { %2829 = vmatpush.bf16.msra.mxu3 %v2730_v42 }
 0x129   : > { %1473 = vrot.lane.b32.xlu1 %v3575_v23, %s5137_s26  ;;  %v3777_v23 = vpop.permute.xlu2 %1355  ;;  %v3779_v36 = vpop.permute.xlu1 %1335  ;;  %1711 = vmatpush.bf16.msra.mxu1 %v2738_v43  ;;  %s4979_s26 = sshll.u32 %s3264_s21, 5  ;;  %s2317_s21 = scalar_lea.sflag [#allocation4], %s3443_s14 }
 0x12a   : > { %5212 = vst [vmem:[#allocation29_spill] sm:$0xff] %v3779_v36  ;;  %v3799_v45 = vpop.permute.xlu0 %1359 }
 0x12b   : > { %2275 = vmatpush.bf16.msra.mxu2 %v2747_v41  ;;  %984 = vmatpush.bf16.msra.mxu0 %v2729_v50 }
 0x12c   : > { %2830 = vmatpush.bf16.msra.mxu3 %v2729_v50 }
 0x12d   : > { %1712 = vmatpush.bf16.msra.mxu1 %v2737_v51 }
 0x12f   : > { %2276 = vmatpush.bf16.msra.mxu2 %v2746_v44  ;;  %985 = vmatpush.bf16.msra.mxu0 %v2728_v54  ;;  %v698_v44 = vld [vmem:[%s560_s13] sm:$0x1]  ;;  %s5227_s13 = sld [smem:[#allocation49_spill]] }
 0x130   : > { %2831 = vmatpush.bf16.msra.mxu3 %v2728_v54  ;;  %v867_v54 = vadd.f32 1.0, %v698_v44 }
 0x131   : > { %v3801_v48 = vpop.permute.xlu2 %1361  ;;  %v3803_v49 = vpop.permute.xlu1 %1357  ;;  %1713 = vmatpush.bf16.msra.mxu1 %v2736_v56 }
 0x133   : > { %2277 = vmatpush.bf16.msra.mxu2 %v2745_v53 }
 0x137   : > { %2278 = vmatpush.bf16.msra.mxu2 %v2744_v57 }
 0x139   : > { %v3825_v18 = vpop.permute.xlu1 %1363 }
 0x13f   : > { %v750_v58 = vpop.xlane.xlu0 %749 }
 0x140   : > { %v764_v61 = vmul.f32 %v750_v58, %v3607_v33 }
 0x141   : > { %v748_v62 = vpop.xlane.xlu2 %747 }
 0x142   : > { %v772_v15 = vadd.f32 1e-06, %v764_v61  ;;  %v763_v16 = vmul.f32 %v748_v62, %v3607_v33 }
 0x144   : > { %3002 = vrsqrt.f32 %v772_v15  ;;  %v771_v19 = vadd.f32 1e-06, %v763_v16  ;;  %vm795_vm2 = vweird.f32 %v772_v15 }
 0x146   : > { %3004 = vrsqrt.f32 %v771_v19  ;;  %vm785_vm5 = vweird.f32 %v771_v19 }
 0x147   : > { %v756_v21 = vpop.xlane.xlu0 %755 }
 0x148   : > { %v767_v22 = vmul.f32 %v756_v21, %v3607_v33 }
 0x149   : > { %v754_v28 = vpop.xlane.xlu2 %753 }
 0x14a   : > { %v3003_v29 = vpop.eup %3002  ;;  %v3828_v30 = vadd.f32 1e-06, %v767_v22  ;;  %v766_v31 = vmul.f32 %v754_v28, %v3607_v33 }
 0x14b   : > { %v790_v32 = vmul.f32 %v3003_v29, %v772_v15  ;;  %v752_v34 = vpop.xlane.xlu1 %751  ;;  %vm796_vm1 = vweird.f32 %v3003_v29 }
 0x14c   : > { %v3005_v38 = vpop.eup %3004  ;;  %v774_v40 = vadd.f32 1e-06, %v766_v31  ;;  %v765_v41 = vmul.f32 %v752_v34, %v3607_v33  ;;  %3006 = vrsqrt.f32 %v3828_v30  ;;  %vm797_vm4 = vmor %vm795_vm2, %vm796_vm1  ;;  %v3842_v34 = vperm.slane %v867_v54, 0 }
 0x14d   : > { %v791_v42 = vmul.f32 %v3003_v29, %v790_v32  ;;  %v780_v43 = vmul.f32 %v3005_v38, %v771_v19  ;;  %vm786_vm3 = vweird.f32 %v3005_v38  ;;  %vm825_vm15 = vweird.f32 %v3828_v30 }
 0x14e   : > { %3008 = vrsqrt.f32 %v774_v40  ;;  %v3835_v50 = vadd.f32 1e-06, %v765_v41  ;;  %vm787_vm6 = vmor %vm785_vm5, %vm786_vm3  ;;  %vm815_vm8 = vweird.f32 %v774_v40 }
 0x14f   : > { %v792_v51 = vmul.f32 0.5, %v791_v42  ;;  %v781_v53 = vmul.f32 %v3005_v38, %v780_v43  ;;  %v762_v21 = vpop.xlane.xlu0 %761 }
 0x150   : > { %3010 = vrsqrt.f32 %v3835_v50  ;;  %vm805_vm11 = vweird.f32 %v3835_v50 }
 0x151   : > { %v793_v56 = vsub.f32 1.5, %v792_v51  ;;  %v782_v57 = vmul.f32 0.5, %v781_v53  ;;  %v760_v58 = vpop.xlane.xlu2 %759  ;;  %v770_v51 = vmul.f32 %v762_v21, %v3607_v33 }
 0x152   : > { %v3838_v61 = vpop.eup %3006  ;;  %v769_v31 = vmul.f32 %v760_v58, %v3607_v33 }
 0x153   : > { %v794_v62 = vmul.f32 %v3003_v29, %v793_v56  ;;  %v783_v16 = vsub.f32 1.5, %v782_v57  ;;  %v758_v22 = vpop.xlane.xlu1 %757  ;;  %v820_v56 = vmul.f32 %v3838_v61, %v3828_v30  ;;  %v3857_v21 = vadd.f32 1e-06, %v770_v51 }
 0x154   : > { %v3009_v28 = vpop.eup %3008  ;;  %v768_v32 = vmul.f32 %v758_v22, %v3607_v33  ;;  %vm826_vm13 = vweird.f32 %v3838_v61 }
 0x155   : > { %v798_v41 = vsel %vm797_vm4, %v3003_v29, %v794_v62  ;;  %v784_v42 = vmul.f32 %v3005_v38, %v783_v16  ;;  %v810_v43 = vmul.f32 %v3009_v28, %v774_v40  ;;  %v3850_v29 = vadd.f32 1e-06, %v769_v31  ;;  %v3855_v16 = vld [vmem:[%s569_s20] ss:$0 sm:$0xff]  ;;  %vm827_vm0 = vmor %vm825_vm15, %vm826_vm13  ;;  %s5228_s20 = smov 96  }
 0x156   : > { %v3011_v44 = vpop.eup %3010  ;;  %v860_v15 = vmul.f32 %v798_v41, %v3612_v37  ;;  %v776_v62 = vadd.f32 1e-06, %v768_v32  ;;  %v821_v41 = vmul.f32 %v3838_v61, %v820_v56  ;;  %vm816_vm7 = vweird.f32 %v3009_v28 }
 0x157   : > { %v788_v53 = vsel %vm787_vm6, %v3005_v38, %v784_v42  ;;  %v811_v57 = vmul.f32 %v3009_v28, %v810_v43  ;;  %v800_v58 = vmul.f32 %v3011_v44, %v3835_v50  ;;  %vm806_vm9 = vweird.f32 %v3011_v44  ;;  %vm817_vm10 = vmor %vm815_vm8, %vm816_vm7 }
 0x158   : > { %v859_v54 = vmul.f32 %v788_v53, %v3615_v39  ;;  %v872_v19 = vmul.f32 %v3842_v34, %v860_v15  ;;  %3012 = vrsqrt.f32 %v776_v62  ;;  %v822_v53 = vmul.f32 0.5, %v821_v41  ;;  %vm807_vm12 = vmor %vm805_vm11, %vm806_vm9 }
 0x159   : > { %v812_v37 = vmul.f32 0.5, %v811_v57  ;;  %v801_v22 = vmul.f32 %v3011_v44, %v800_v58  ;;  %3014 = vrsqrt.f32 %v3850_v29  ;;  %vm835_vm1 = vweird.f32 %v776_v62 }
 0x15a   : > { %v871_v38 = vmul.f32 %v3842_v34, %v859_v54  ;;  %v883_v32 = vadd.f32 %v3855_v16, %v872_v19  ;;  %3016 = vrsqrt.f32 %v3857_v21  ;;  %vm845_vm5 = vweird.f32 %v3850_v29 }
 0x15b   : > { %v813_v42 = vsub.f32 1.5, %v812_v37  ;;  %v802_v39 = vmul.f32 0.5, %v801_v22  ;;  %vm855_vm7 = vweird.f32 %v3857_v21 }
 0x15c   : > { %v882_v31 = vadd.f32 %v3855_v16, %v871_v38 }
 0x15d   : > { %v814_v43 = vmul.f32 %v3009_v28, %v813_v42  ;;  %v803_v15 = vsub.f32 1.5, %v802_v39  ;;  %v823_v42 = vsub.f32 1.5, %v822_v53 }
 0x15e   : > { %v890_v51 = vpack.c.bf16 %v883_v32, %v882_v31  ;;  %v3013_v58 = vpop.eup %3012 }
 0x15f   : > { %v818_v57 = vsel %vm817_vm10, %v3009_v28, %v814_v43  ;;  %v804_v56 = vmul.f32 %v3011_v44, %v803_v15  ;;  %v830_v37 = vmul.f32 %v3013_v58, %v776_v62  ;;  %v3015_v40 = vpop.eup %3014  ;;  %v824_v32 = vmul.f32 %v3838_v61, %v823_v42 }
 0x160   : > { %v862_v54 = vmul.f32 %v818_v57, %v3628_v47  ;;  %986 = vmatmul.bf16.vlgmr.msra.gmra.mxu0 %v890_v51  ;;  %1714 = vmatmul.bf16.vlgmr.msra.gmra.mxu1 %v890_v51  ;;  %v3017_v28 = vpop.eup %3016  ;;  %v840_v50 = vmul.f32 %v3015_v40, %v3850_v29  ;;  %vm836_vm14 = vweird.f32 %v3013_v58  ;;  %vm846_vm3 = vweird.f32 %v3015_v40 }
 0x161   : > { %v808_v19 = vsel %vm807_vm12, %v3011_v44, %v804_v56  ;;  %2279 = vmatmul.bf16.vlgmr.msra.gmra.mxu2 %v890_v51  ;;  %v831_v41 = vmul.f32 %v3013_v58, %v830_v37  ;;  %vm837_vm2 = vmor %vm835_vm1, %vm836_vm14  ;;  %v828_v57 = vsel %vm827_vm0, %v3838_v61, %v824_v32  ;;  %vm856_vm4 = vweird.f32 %v3017_v28 }
 0x162   : > { %v861_v22 = vmul.f32 %v808_v19, %v3636_v52  ;;  %v874_v38 = vmul.f32 %v3842_v34, %v862_v54  ;;  %v850_v52 = vmul.f32 %v3017_v28, %v3857_v21  ;;  %v841_v51 = vmul.f32 %v3015_v40, %v840_v50  ;;  %vm847_vm6 = vmor %vm845_vm5, %vm846_vm3 }
 0x163   : > { %v832_v31 = vmul.f32 0.5, %v831_v41  ;;  %vm857_vm8 = vmor %vm855_vm7, %vm856_vm4 }
 0x164   : > { %v873_v39 = vmul.f32 %v3842_v34, %v861_v22  ;;  %v885_v44 = vadd.f32 %v3855_v16, %v874_v38  ;;  %v851_v56 = vmul.f32 %v3017_v28, %v850_v52  ;;  %v842_v37 = vmul.f32 0.5, %v841_v51 }
 0x165   : > { %v833_v43 = vsub.f32 1.5, %v832_v31  ;;  %v863_v22 = vmul.f32 %v828_v57, %v3625_v46 }
 0x166   : > { %v884_v47 = vadd.f32 %v3855_v16, %v873_v39  ;;  %v852_v38 = vmul.f32 0.5, %v851_v56  ;;  %v843_v42 = vsub.f32 1.5, %v842_v37 }
 0x167   : > { %v834_v53 = vmul.f32 %v3013_v58, %v833_v43  ;;  %v875_v41 = vmul.f32 %v3842_v34, %v863_v22 }
 0x168   : > { %v891_v15 = vpack.c.bf16 %v885_v44, %v884_v47  ;;  %v853_v62 = vsub.f32 1.5, %v852_v38  ;;  %v844_v50 = vmul.f32 %v3015_v40, %v843_v42  ;;  %v3925_v38 = vld [vmem:[%s5116_s10] ss:$0 sm:$0xff] }
 0x169   : > { %v838_v54 = vsel %vm837_vm2, %v3013_v58, %v834_v53  ;;  %v886_v61 = vadd.f32 %v3855_v16, %v875_v41 }
 0x16a   : > { %991 = vmatmul.bf16.vlgmr.msra.gmra.mxu3 %v891_v15  ;;  %v864_v19 = vmul.f32 %v838_v54, %v3651_v60  ;;  %v854_v58 = vmul.f32 %v3017_v28, %v853_v62  ;;  %v848_v60 = vsel %vm847_vm6, %v3015_v40, %v844_v50 }
 0x16b   : > { %v865_v47 = vmul.f32 %v848_v60, %v3648_v59  ;;  %v3895_v59 = vld [vmem:[%s5114_s8] ss:$0 sm:$0xff] }
 0x16c   : > { %v876_v30 = vmul.f32 %v3842_v34, %v864_v19  ;;  %v858_v31 = vsel %vm857_vm8, %v3017_v28, %v854_v58 }
 0x16d   : > { %v866_v44 = vmul.f32 %v858_v31, %v3640_v55  ;;  %v877_v32 = vmul.f32 %v3842_v34, %v865_v47  ;;  %v3900_v55 = vld [vmem:[%s5115_s9] ss:$0 sm:$0xff] }
 0x16e   : > { %v887_v39 = vadd.f32 %v3855_v16, %v876_v30 }
 0x16f   : > { %v878_v52 = vmul.f32 %v3842_v34, %v866_v44  ;;  %v888_v29 = vadd.f32 %v3855_v16, %v877_v32 }
 0x170   : > { %1719 = vmatmul.bf16.gmra.mxu1 %v891_v15  ;;  %v892_v46 = vpack.c.bf16 %v887_v39, %v886_v61 }
 0x171   : > { %2284 = vmatmul.bf16.gmra.mxu2 %v891_v15  ;;  %v889_v43 = vadd.f32 %v3855_v16, %v878_v52 }
 0x173   : > { %v893_v15 = vpack.c.bf16 %v889_v43, %v888_v29 }
 0x17a   : > { %996 = vmatmul.bf16.gmra.mxu3 %v892_v46 }
 0x180   : > { %1724 = vmatmul.bf16.gmra.mxu1 %v892_v46 }
 0x181   : > { %2289 = vmatmul.bf16.gmra.mxu2 %v892_v46 }
 0x18a   : > { %1001 = vmatmul.bf16.gmra.mxu3 %v893_v15 }
 0x190   : > { %1729 = vmatmul.bf16.gmra.mxu1 %v893_v15 }
 0x191   : > { %2294 = vmatmul.bf16.gmra.mxu2 %v893_v15 }
 0x1dd   : > { %v987_v21 = vpop.f32.mrf.mxu0  ;;  %v1715_v34 = vpop.f32.mrf.mxu1 }
 0x1de   : > { %v3903_v40 = vadd.f32 %v3895_v59, %v987_v21  ;;  %v3906_v16 = vadd.f32 %v3900_v55, %v1715_v34 }
 0x1e0   : > { %v1736_v28 = vmul.f32 %v3906_v16, %v3906_v16  ;;  %v1008_v51 = vmul.f32 %v3903_v40, %v3903_v40 }
 0x1e2   : > { %1744 = vadd.xlane.f32.xlu2 %v1736_v28  ;;  %1016 = vadd.xlane.f32.xlu1 %v1008_v51 }
 0x1e4   : > { %v2280_v53 = vpop.f32.mrf.mxu2 }
 0x1e5   : > { %v989_v57 = vpop.f32.mrf.mxu0  ;;  %v1717_v56 = vpop.f32.mrf.mxu1  ;;  %v2281_v42 = vadd.f32 %v3925_v38, %v2280_v53 }
 0x1e6   : > { %v3913_v54 = vadd.f32 %v3895_v59, %v989_v57  ;;  %v3916_v19 = vadd.f32 %v3900_v55, %v1717_v56 }
 0x1e8   : > { %v1009_v37 = vmul.f32 %v3913_v54, %v3913_v54  ;;  %v1737_v22 = vmul.f32 %v3916_v19, %v3916_v19 }
 0x1ea   : > { %1018 = vadd.xlane.f32.xlu2 %v1009_v37  ;;  %1746 = vadd.xlane.f32.xlu1 %v1737_v22 }
 0x1ec   : > { %v2282_v30 = vpop.f32.mrf.mxu2 }
 0x1ed   : > { %v2283_v41 = vadd.f32 %v3925_v38, %v2282_v30  ;;  %v992_v62 = vpop.f32.mrf.mxu3  ;;  %v1720_v39 = vpop.f32.mrf.mxu1 }
 0x1ee   : > { %v3933_v50 = vadd.f32 %v3895_v59, %v992_v62  ;;  %v3942_v46 = vadd.f32 %v3900_v55, %v1720_v39 }
 0x1ef   : > { %v2798_v61 = vpack.c.bf16 %v2283_v41, %v2281_v42 }
 0x1f0   : > { %v1010_v58 = vmul.f32 %v3933_v50, %v3933_v50  ;;  %v1738_v32 = vmul.f32 %v3942_v46, %v3942_v46 }
 0x1f1   : > { %2799 = vst [vmem:[%s3938_s28] sm:$0xff] %v2798_v61  }
 0x1f2   : > { %1020 = vadd.xlane.f32.xlu0 %v1010_v58 }
 0x1f4   : > { %v2285_v60 = vpop.f32.mrf.mxu2 }
 0x1f5   : > { %v994_v31 = vpop.f32.mrf.mxu3  ;;  %v1722_v47 = vpop.f32.mrf.mxu1  ;;  %v2286_v43 = vadd.f32 %v3925_v38, %v2285_v60 }
 0x1f6   : > { %v3945_v44 = vadd.f32 %v3895_v59, %v994_v31  ;;  %v3965_v37 = vadd.f32 %v3900_v55, %v1722_v47 }
 0x1f8   : > { %v1011_v52 = vmul.f32 %v3945_v44, %v3945_v44  ;;  %v1739_v39 = vmul.f32 %v3965_v37, %v3965_v37 }
 0x1fa   : > { %1748 = vadd.xlane.f32.xlu0 %v1738_v32  ;;  %1022 = vadd.xlane.f32.xlu1 %v1011_v52 }
 0x1fc   : > { %v2287_v29 = vpop.f32.mrf.mxu2 }
 0x1fd   : > { %v2288_v15 = vadd.f32 %v3925_v38, %v2287_v29  ;;  %v997_v21 = vpop.f32.mrf.mxu3  ;;  %v1725_v34 = vpop.f32.mrf.mxu1 }
 0x1fe   : > { %v3954_v28 = vadd.f32 %v3895_v59, %v997_v21  ;;  %v3957_v51 = vadd.f32 %v3900_v55, %v1725_v34  ;;  %v3986_v21 = vpop.permute.xlu1 %1369 }
 0x1ff   : > { %v2803_v53 = vpack.c.bf16 %v2288_v15, %v2286_v43  ;;  %5213 = vst [vmem:[#allocation30_spill] sm:$0xff] %v3986_v21 }
 0x200   : > { %v1740_v57 = vmul.f32 %v3957_v51, %v3957_v51  ;;  %v1012_v56 = vmul.f32 %v3954_v28, %v3954_v28 }
 0x201   : > { %2821 = vst [vmem:[%s3938_s28 + $0x8] sm:$0xff] %v2803_v53  }
 0x202   : > { %1752 = vadd.xlane.f32.xlu1 %v1740_v57  ;;  %1024 = vadd.xlane.f32.xlu2 %v1012_v56 }
 0x204   : > { %v2290_v22 = vpop.f32.mrf.mxu2 }
 0x205   : > { %v999_v30 = vpop.f32.mrf.mxu3  ;;  %v1727_v42 = vpop.f32.mrf.mxu1  ;;  %v2291_v60 = vadd.f32 %v3925_v38, %v2290_v22 }
 0x206   : > { %v3968_v41 = vadd.f32 %v3895_v59, %v999_v30  ;;  %v3975_v61 = vadd.f32 %v3900_v55, %v1727_v42 }
 0x208   : > { %v1013_v62 = vmul.f32 %v3968_v41, %v3968_v41  ;;  %v1741_v43 = vmul.f32 %v3975_v61, %v3975_v61 }
 0x20a   : > { %1026 = vadd.xlane.f32.xlu0 %v1013_v62  ;;  %1750 = vadd.xlane.f32.xlu2 %v1739_v39  ;;  %v3999_v62 = vpop.permute.xlu1 %1427  ;;  %v4001_v39 = vpop.permute.xlu2 %1367 }
 0x20b   : > { %5216 = vst [vmem:[#allocation33_spill] sm:$0xff] %v3999_v62 }
 0x20c   : > { %v2292_v58 = vpop.f32.mrf.mxu2  ;;  %5217 = vst [vmem:[#allocation34_spill] sm:$0xff] %v4001_v39 }
 0x20d   : > { %v2293_v31 = vadd.f32 %v3925_v38, %v2292_v58  ;;  %v1002_v47 = vpop.f32.mrf.mxu3  ;;  %v1730_v32 = vpop.f32.mrf.mxu1 }
 0x20e   : > { %v3980_v52 = vadd.f32 %v3895_v59, %v1002_v47  ;;  %v4004_v58 = vadd.f32 %v3900_v55, %v1730_v32 }
 0x20f   : > { %v2808_v29 = vpack.c.bf16 %v2293_v31, %v2291_v60 }
 0x210   : > { %v1014_v15 = vmul.f32 %v3980_v52, %v3980_v52 }
 0x211   : > { %2822 = vst [vmem:[%s3938_s28 + $0x10] sm:$0xff] %v2808_v29   ;;  %v1742_v29 = vmul.f32 %v4004_v58, %v4004_v58 }
 0x212   : > { %1754 = vadd.xlane.f32.xlu0 %v1741_v43  ;;  %1028 = vadd.xlane.f32.xlu1 %v1014_v15  ;;  %v4011_v43 = vpop.permute.xlu1 %1433  ;;  %v4013_v15 = vpop.permute.xlu2 %1431 }
 0x213   : > { %5218 = vst [vmem:[#allocation35_spill] sm:$0xff] %v4011_v43 }
 0x214   : > { %v2295_v34 = vpop.f32.mrf.mxu2  ;;  %5219 = vst [vmem:[#allocation36_spill] sm:$0xff] %v4013_v15 }
 0x215   : > { %v1004_v53 = vpop.f32.mrf.mxu3  ;;  %v1732_v57 = vpop.f32.mrf.mxu1  ;;  %v2296_v60 = vadd.f32 %v3925_v38, %v2295_v34 }
 0x216   : > { %v3990_v56 = vadd.f32 %v3895_v59, %v1004_v53  ;;  %v3993_v22 = vadd.f32 %v3900_v55, %v1732_v57  ;;  %v4015_v53 = vpop.permute.xlu0 %1365 }
 0x218   : > { %5214 = vst [vmem:[#allocation31_spill] sm:$0xff] %v3990_v56  ;;  %v1015_v30 = vmul.f32 %v3990_v56, %v3990_v56  ;;  %v1743_v42 = vmul.f32 %v3993_v22, %v3993_v22 }
 0x219   : > { %5215 = vst [vmem:[#allocation32_spill] sm:$0xff] %v3993_v22 }
 0x21a   : > { %1030 = vadd.xlane.f32.xlu2 %v1015_v30  ;;  %1758 = vadd.xlane.f32.xlu1 %v1743_v42  ;;  %v4017_v57 = vpop.permute.xlu1 %1439  ;;  %v4019_v55 = vpop.permute.xlu2 %1437 }
 0x21b   : > { %5220 = vst [vmem:[#allocation37_spill] sm:$0xff] %v4017_v57 }
 0x21c   : > { %v2297_v59 = vpop.f32.mrf.mxu2  ;;  %5221 = vst [vmem:[#allocation38_spill] sm:$0xff] %v4019_v55 }
 0x21d   : > { %v2298_v31 = vadd.f32 %v3925_v38, %v2297_v59 }
 0x21e   : > { %v4021_v32 = vpop.permute.xlu0 %1429 }
 0x21f   : > { %v2813_v47 = vpack.c.bf16 %v2298_v31, %v2296_v60  ;;  %5222 = vst [vmem:[#allocation39_spill] sm:$0xff] %v4021_v32 }
 0x221   : > { %2823 = vst [vmem:[%s3938_s28 + $0x18] sm:$0xff] %v2813_v47  }
 0x222   : > { %1756 = vadd.xlane.f32.xlu2 %v1742_v29  ;;  %v4023_v34 = vpop.permute.xlu1 %1461  ;;  %v4025_v38 = vpop.permute.xlu2 %1459 }
 0x226   : > { %v4027_v30 = vpop.permute.xlu0 %1435 }
 0x227   : > { %5223 = vst [vmem:[#allocation40_spill] sm:$0xff] %v4027_v30 }
 0x22a   : > { %v4029_v42 = vpop.permute.xlu1 %1467  ;;  %v4031_v59 = vpop.permute.xlu2 %1465 }
 0x22e   : > { %v4033_v60 = vpop.permute.xlu0 %1441 }
 0x22f   : > { %5224 = vst [vmem:[#allocation41_spill] sm:$0xff] %v4033_v60 }
 0x232   : > { %v4035_v31 = vpop.permute.xlu1 %1473  ;;  %v4037_v47 = vpop.permute.xlu2 %1471 }
 0x233   : > { %5225 = vst [vmem:[#allocation42_spill] sm:$0xff] %v4035_v31 }
 0x234   : > { %5226 = vst [vmem:[#allocation43_spill] sm:$0xff] %v4037_v47 }
 0x236   : > { %v4039_v29 = vpop.permute.xlu0 %1463 }
 0x23e   : > { %v4043_v43 = vpop.permute.xlu0 %1469 }
 0x255   : > { %v1745_v57 = vpop.xlane.xlu2 %1744  ;;  %v1017_v36 = vpop.xlane.xlu1 %1016 }
 0x256   : > { %v1760_v35 = vmul.f32 %v1745_v57, %v3607_v33  ;;  %v1032_v55 = vmul.f32 %v1017_v36, %v3607_v33 }
 0x258   : > { %v1768_v27 = vadd.f32 1e-06, %v1760_v35  ;;  %v1040_v30 = vadd.f32 1e-06, %v1032_v55 }
 0x25a   : > { %3018 = vrsqrt.f32 %v1768_v27  ;;  %vm1782_vm11 = vweird.f32 %v1768_v27  ;;  %vm1054_vm13 = vweird.f32 %v1040_v30 }
 0x25b   : > { %3020 = vrsqrt.f32 %v1040_v30 }
 0x25d   : > { %v1019_v20 = vpop.xlane.xlu2 %1018  ;;  %v1747_v36 = vpop.xlane.xlu1 %1746 }
 0x25e   : > { %v1033_v60 = vmul.f32 %v1019_v20, %v3607_v33  ;;  %v1761_v20 = vmul.f32 %v1747_v36, %v3607_v33 }
 0x260   : > { %v3019_v17 = vpop.eup %3018  ;;  %v4046_v4 = vadd.f32 1e-06, %v1033_v60 }
 0x261   : > { %v3021_v15 = vpop.eup %3020  ;;  %v1777_v21 = vmul.f32 %v3019_v17, %v1768_v27  ;;  %vm1783_vm9 = vweird.f32 %v3019_v17  ;;  %v4065_v27 = vadd.f32 1e-06, %v1761_v20 }
 0x262   : > { %v1049_v31 = vmul.f32 %v3021_v15, %v1040_v30  ;;  %3022 = vrsqrt.f32 %v4046_v4  ;;  %vm1055_vm10 = vweird.f32 %v3021_v15  ;;  %vm1784_vm12 = vmor %vm1782_vm11, %vm1783_vm9  ;;  %vm1064_vm3 = vweird.f32 %v4046_v4 }
 0x263   : > { %v1778_v57 = vmul.f32 %v3019_v17, %v1777_v21  ;;  %v4056_v21 = vld [vmem:[%s5118_s12] ss:$0 sm:$0xff]  ;;  %vm1056_vm14 = vmor %vm1054_vm13, %vm1055_vm10  ;;  %vm1792_vm6 = vweird.f32 %v4065_v27 }
 0x264   : > { %v1050_v10 = vmul.f32 %v3021_v15, %v1049_v31 }
 0x265   : > { %v1779_v35 = vmul.f32 0.5, %v1778_v57  ;;  %v1021_v55 = vpop.xlane.xlu0 %1020 }
 0x266   : > { %v1051_v13 = vmul.f32 0.5, %v1050_v10  ;;  %v1034_v47 = vmul.f32 %v1021_v55, %v3607_v33 }
 0x267   : > { %v1780_v56 = vsub.f32 1.5, %v1779_v35 }
 0x268   : > { %v4051_v22 = vpop.eup %3022  ;;  %v1052_v60 = vsub.f32 1.5, %v1051_v13  ;;  %v1042_v62 = vadd.f32 1e-06, %v1034_v47  ;;  %v4063_v13 = vld [vmem:[%s5227_s13] ss:$0 sm:$0xff] }
 0x269   : > { %v1781_v32 = vmul.f32 %v3019_v17, %v1780_v56  ;;  %v1059_v31 = vmul.f32 %v4051_v22, %v4046_v4  ;;  %vm1065_vm1 = vweird.f32 %v4051_v22 }
 0x26a   : > { %v1053_v10 = vmul.f32 %v3021_v15, %v1052_v60  ;;  %3024 = vrsqrt.f32 %v1042_v62  ;;  %vm1074_vm0 = vweird.f32 %v1042_v62  ;;  %vm1066_vm4 = vmor %vm1064_vm3, %vm1065_vm1 }
 0x26b   : > { %v1785_v57 = vsel %vm1784_vm12, %v3019_v17, %v1781_v32  ;;  %v1060_v35 = vmul.f32 %v4051_v22, %v1059_v31  ;;  %3026 = vrsqrt.f32 %v4065_v27 }
 0x26c   : > { %v1856_v56 = vmul.f32 %v1785_v57, %v3906_v16  ;;  %v1057_v47 = vsel %vm1056_vm14, %v3021_v15, %v1053_v10 }
 0x26d   : > { %v1128_v36 = vmul.f32 %v1057_v47, %v3903_v40  ;;  %v1061_v15 = vmul.f32 0.5, %v1060_v35  ;;  %v1023_v57 = vpop.xlane.xlu1 %1022  ;;  %v1749_v47 = vpop.xlane.xlu0 %1748 }
 0x26e   : > { %v4070_v30 = vmul.f32 %v4056_v21, %v1856_v56  ;;  %v1035_v35 = vmul.f32 %v1023_v57, %v3607_v33 }
 0x26f   : > { %v4074_v17 = vmul.f32 %v4063_v13, %v1128_v36  ;;  %v1062_v56 = vsub.f32 1.5, %v1061_v15 }
 0x270   : > { %v3025_v32 = vpop.eup %3024  ;;  %v1995_v55 = vmul.f32 %v4070_v30, %v3777_v23  ;;  %v4096_v57 = vadd.f32 1e-06, %v1035_v35 }
 0x271   : > { %v1069_v20 = vmul.f32 %v3025_v32, %v1042_v62  ;;  %v1275_v16 = vmul.f32 %v3681_v7, %v4074_v17  ;;  %v1187_v60 = vmul.f32 %v3659_v0, %v4074_v17  ;;  %v3027_v10 = vpop.eup %3026  ;;  %vm1075_vm15 = vweird.f32 %v3025_v32 }
 0x272   : > { %2011 = vrot.lane.b32.xlu2 %v1995_v55, %s5228_s20  ;;  %v1787_v39 = vmul.f32 %v3027_v10, %v4065_v27  ;;  %vm1076_vm2 = vmor %vm1074_vm0, %vm1075_vm15  ;;  %3028 = vrsqrt.f32 %v4096_v57  ;;  %vm1793_vm5 = vweird.f32 %v3027_v10  ;;  %v1939_v27 = vmul.f32 %v4070_v30, %v3681_v7 }
 0x273   : > { %v1070_v40 = vmul.f32 %v3025_v32, %v1069_v20  ;;  %1291 = vrot.lane.b32.xlu0 %v1275_v16, %s5228_s20  ;;  %1203 = vrot.lane.b32.xlu1 %v1187_v60, %s5228_s20  ;;  %v1762_v20 = vmul.f32 %v1749_v47, %v3607_v33  ;;  %v1379_v16 = vmul.f32 %v3777_v23, %v4074_v17  ;;  %vm1794_vm7 = vmor %vm1792_vm6, %vm1793_vm5  ;;  %vm1084_vm10 = vweird.f32 %v4096_v57 }
 0x274   : > { %v1788_v60 = vmul.f32 %v3027_v10, %v1787_v39 }
 0x275   : > { %v1071_v31 = vmul.f32 0.5, %v1070_v40  ;;  %v1063_v40 = vmul.f32 %v4051_v22, %v1062_v56  ;;  %v4098_v62 = vadd.f32 1e-06, %v1762_v20 }
 0x276   : > { %v1789_v47 = vmul.f32 0.5, %v1788_v60  ;;  %v1883_v60 = vmul.f32 %v4070_v30, %v3659_v0 }
 0x277   : > { %v1072_v36 = vsub.f32 1.5, %v1071_v31  ;;  %v1067_v23 = vsel %vm1066_vm4, %v4051_v22, %v1063_v40  ;;  %3030 = vrsqrt.f32 %v4098_v62  ;;  %vm1802_vm12 = vweird.f32 %v4098_v62 }
 0x278   : > { %v1129_v4 = vmul.f32 %v1067_v23, %v3913_v54  ;;  %v1790_v22 = vsub.f32 1.5, %v1789_v47  ;;  %v3029_v35 = vpop.eup %3028  ;;  %v1025_v54 = vpop.xlane.xlu2 %1024 }
 0x279   : > { %v1073_v55 = vmul.f32 %v3025_v32, %v1072_v36  ;;  %v1079_v40 = vmul.f32 %v3029_v35, %v4096_v57  ;;  %vm1085_vm8 = vweird.f32 %v3029_v35 }
 0x27a   : > { %v4117_v36 = vmul.f32 %v4063_v13, %v1129_v4  ;;  %v1791_v20 = vmul.f32 %v3027_v10, %v1790_v22  ;;  %vm1086_vm11 = vmor %vm1084_vm10, %vm1085_vm8 }
 0x27b   : > { %v1077_v15 = vsel %vm1076_vm2, %v3025_v32, %v1073_v55  ;;  %1395 = vrot.lane.b32.xlu0 %v1379_v16, %s5228_s20 }
 0x27c   : > { %v1130_v31 = vmul.f32 %v1077_v15, %v3933_v50  ;;  %v1483_v50 = vmul.f32 %v4025_v38, %v4074_v17  ;;  %v1036_v15 = vmul.f32 %v1025_v54, %v3607_v33  ;;  %v1795_v47 = vsel %vm1794_vm7, %v3027_v10, %v1791_v20 }
 0x27d   : > { %v3031_v55 = vpop.eup %3030  ;;  %v1380_v10 = vmul.f32 %v3803_v49, %v4117_v36 }
 0x27e   : > { %v4102_v56 = vmul.f32 %v4063_v13, %v1130_v31  ;;  %v1276_v31 = vmul.f32 %v3683_v24, %v4117_v36  ;;  %v1797_v23 = vmul.f32 %v3031_v55, %v4098_v62  ;;  %v4132_v4 = vadd.f32 1e-06, %v1036_v15 }
 0x27f   : > { %vm1803_vm9 = vweird.f32 %v3031_v55 }
 0x280   : > { %v1277_v32 = vmul.f32 %v3691_v25, %v4102_v56  ;;  %v1189_v39 = vmul.f32 %v3657_v63, %v4102_v56  ;;  %v1381_v16 = vmul.f32 %v3799_v45, %v4102_v56  ;;  %v1798_v0 = vmul.f32 %v3031_v55, %v1797_v23  ;;  %vm1804_vm13 = vmor %vm1802_vm12, %vm1803_vm9 }
 0x281   : > { %v1485_v54 = vmul.f32 %v4039_v29, %v4102_v56  ;;  %3032 = vrsqrt.f32 %v4132_v4  ;;  %vm1094_vm15 = vweird.f32 %v4132_v4 }
 0x282   : > { %1295 = vrot.lane.b32.xlu1 %v1277_v32, %s5228_s20  ;;  %1207 = vrot.lane.b32.xlu2 %v1189_v39, %s5228_s20  ;;  %v1080_v32 = vmul.f32 %v3029_v35, %v1079_v40  ;;  %v1857_v39 = vmul.f32 %v1795_v47, %v3916_v19  ;;  %v1799_v20 = vmul.f32 0.5, %v1798_v0  ;;  %v2051_v47 = vmul.f32 %v4070_v30, %v4025_v38 }
 0x283   : > { %1499 = vrot.lane.b32.xlu0 %v1483_v50, %s5228_s20  ;;  %v1027_v50 = vpop.xlane.xlu0 %1026 }
 0x284   : > { %v1037_v22 = vmul.f32 %v1027_v50, %v3607_v33  ;;  %v4147_v19 = vmul.f32 %v4056_v21, %v1857_v39 }
 0x286   : > { %v4149_v40 = vadd.f32 1e-06, %v1037_v22  ;;  %v1940_v7 = vmul.f32 %v4147_v19, %v3683_v24  ;;  %v2052_v57 = vmul.f32 %v4147_v19, %v4023_v34 }
 0x288   : > { %3034 = vrsqrt.f32 %v4149_v40  ;;  %vm1104_vm2 = vweird.f32 %v4149_v40 }
 0x28a   : > { %1399 = vrot.lane.b32.xlu1 %v1381_v16, %s5228_s20  ;;  %1293 = vrot.lane.b32.xlu2 %v1276_v31, %s5228_s20  ;;  %v1081_v16 = vmul.f32 0.5, %v1080_v32  ;;  %v3033_v31 = vpop.eup %3032  ;;  %v1484_v32 = vmul.f32 %v4023_v34, %v4117_v36  ;;  %v1753_v34 = vpop.xlane.xlu1 %1752 }
 0x28b   : > { %1899 = vrot.lane.b32.xlu0 %v1883_v60, %s5228_s20  ;;  %v1800_v60 = vsub.f32 1.5, %v1799_v20  ;;  %v1089_v0 = vmul.f32 %v3033_v31, %v4132_v4  ;;  %vm1095_vm14 = vweird.f32 %v3033_v31 }
 0x28c   : > { %v1082_v15 = vsub.f32 1.5, %v1081_v16  ;;  %vm1096_vm0 = vmor %vm1094_vm15, %vm1095_vm14 }
 0x28d   : > { %v1801_v50 = vmul.f32 %v3031_v55, %v1800_v60  ;;  %v1090_v22 = vmul.f32 %v3033_v31, %v1089_v0 }
 0x28e   : > { %v1083_v23 = vmul.f32 %v3029_v35, %v1082_v15  ;;  %v3035_v38 = vpop.eup %3034 }
 0x28f   : > { %v1805_v39 = vsel %vm1804_vm13, %v3031_v55, %v1801_v50  ;;  %v1099_v62 = vmul.f32 %v3035_v38, %v4149_v40  ;;  %v1091_v55 = vmul.f32 0.5, %v1090_v22  ;;  %vm1105_vm1 = vweird.f32 %v3035_v38 }
 0x290   : > { %v1087_v24 = vsel %vm1086_vm11, %v3029_v35, %v1083_v23  ;;  %v1884_v35 = vmul.f32 %v4147_v19, %v3663_v2  ;;  %vm1106_vm3 = vmor %vm1104_vm2, %vm1105_vm1 }
 0x291   : > { %v1131_v16 = vmul.f32 %v1087_v24, %v3945_v44  ;;  %v1100_v60 = vmul.f32 %v3035_v38, %v1099_v62 }
 0x292   : > { %1503 = vrot.lane.b32.xlu1 %v1485_v54, %s5228_s20  ;;  %1397 = vrot.lane.b32.xlu2 %v1380_v10, %s5228_s20  ;;  %v1751_v54 = vpop.xlane.xlu2 %1750  ;;  %v1858_v10 = vmul.f32 %v1805_v39, %v3942_v46 }
 0x293   : > { %1955 = vrot.lane.b32.xlu0 %v1939_v27, %s5228_s20  ;;  %v1188_v27 = vmul.f32 %v3663_v2, %v4117_v36  ;;  %v1763_v20 = vmul.f32 %v1751_v54, %v3607_v33  ;;  %v4178_v44 = vmul.f32 %v4063_v13, %v1131_v16  ;;  %v1764_v2 = vmul.f32 %v1753_v34, %v3607_v33 }
 0x294   : > { %v4181_v46 = vmul.f32 %v4056_v21, %v1858_v10 }
 0x295   : > { %v4183_v15 = vadd.f32 1e-06, %v1763_v20  ;;  %v1190_v23 = vmul.f32 %v3667_v3, %v4178_v44  ;;  %v4194_v24 = vadd.f32 1e-06, %v1764_v2  ;;  %v1382_v34 = vmul.f32 %v3801_v48, %v4178_v44 }
 0x296   : > { %v1941_v50 = vmul.f32 %v4181_v46, %v3691_v25  ;;  %v1885_v25 = vmul.f32 %v4181_v46, %v3657_v63 }
 0x297   : > { %3036 = vrsqrt.f32 %v4183_v15  ;;  %vm1812_vm5 = vweird.f32 %v4183_v15  ;;  %vm1822_vm8 = vweird.f32 %v4194_v24 }
 0x298   : > { %3038 = vrsqrt.f32 %v4194_v24 }
 0x29a   : > { %1957 = vrot.lane.b32.xlu1 %v1940_v7, %s5228_s20  ;;  %1501 = vrot.lane.b32.xlu2 %v1484_v32, %s5228_s20  ;;  %v1092_v7 = vsub.f32 1.5, %v1091_v55  ;;  %v1996_v32 = vmul.f32 %v4147_v19, %v3803_v49  ;;  %v1997_v55 = vmul.f32 %v4181_v46, %v3799_v45  ;;  %v1755_v45 = vpop.xlane.xlu0 %1754 }
 0x29b   : > { %2067 = vrot.lane.b32.xlu0 %v2051_v47, %s5228_s20  ;;  %v1101_v47 = vmul.f32 0.5, %v1100_v60 }
 0x29c   : > { %v1093_v0 = vmul.f32 %v3033_v31, %v1092_v7 }
 0x29d   : > { %v1102_v39 = vsub.f32 1.5, %v1101_v47  ;;  %v3037_v54 = vpop.eup %3036 }
 0x29e   : > { %v1097_v22 = vsel %vm1096_vm0, %v3033_v31, %v1093_v0  ;;  %v1807_v4 = vmul.f32 %v3037_v54, %v4183_v15  ;;  %v4210_v31 = vpop.xlane.xlu2 %1030  ;;  %v4214_v63 = vpop.eup %3038  ;;  %vm1813_vm4 = vweird.f32 %v3037_v54 }
 0x29f   : > { %v1132_v49 = vmul.f32 %v1097_v22, %v3954_v28  ;;  %v1103_v16 = vmul.f32 %v3035_v38, %v1102_v39  ;;  %v1817_v62 = vmul.f32 %v4214_v63, %v4194_v24  ;;  %v1486_v22 = vmul.f32 %v4031_v59, %v4178_v44  ;;  %vm1814_vm6 = vmor %vm1812_vm5, %vm1813_vm4 }
 0x2a0   : > { %v1808_v20 = vmul.f32 %v3037_v54, %v1807_v4  ;;  %vm1823_vm7 = vweird.f32 %v4214_v63 }
 0x2a1   : > { %v4217_v28 = vmul.f32 %v4063_v13, %v1132_v49  ;;  %v1107_v10 = vsel %vm1106_vm3, %v3035_v38, %v1103_v16  ;;  %vm1824_vm9 = vmor %vm1822_vm8, %vm1823_vm7 }
 0x2a2   : > { %2069 = vrot.lane.b32.xlu1 %v2052_v57, %s5228_s20  ;;  %1901 = vrot.lane.b32.xlu2 %v1884_v35, %s5228_s20  ;;  %v2053_v57 = vmul.f32 %v4181_v46, %v4039_v29  ;;  %v1029_v29 = vpop.xlane.xlu1 %1028  ;;  %v1133_v40 = vmul.f32 %v1107_v10, %v3968_v41  ;;  %v1809_v7 = vmul.f32 0.5, %v1808_v20  ;;  %v1818_v41 = vmul.f32 %v4214_v63, %v1817_v62 }
 0x2a3   : > { %1205 = vrot.lane.b32.xlu0 %v1188_v27, %s5228_s20  ;;  %v1278_v27 = vmul.f32 %v3695_v11, %v4178_v44  ;;  %v1038_v35 = vmul.f32 %v1029_v29, %v3607_v33  ;;  %v1279_v60 = vmul.f32 %v3697_v26, %v4217_v28 }
 0x2a4   : > { %v4234_v38 = vmul.f32 %v4063_v13, %v1133_v40  ;;  %v1810_v47 = vsub.f32 1.5, %v1809_v7  ;;  %v1191_v40 = vmul.f32 %v3661_v1, %v4217_v28 }
 0x2a5   : > { %v4236_v2 = vadd.f32 1e-06, %v1038_v35 }
 0x2a6   : > { %v1280_v39 = vmul.f32 %v3705_v8, %v4234_v38  ;;  %v1811_v49 = vmul.f32 %v3037_v54, %v1810_v47  ;;  %v1384_v20 = vmul.f32 %v4015_v53, %v4234_v38 }
 0x2a7   : > { %3040 = vrsqrt.f32 %v4236_v2  ;;  %vm1114_vm11 = vweird.f32 %v4236_v2 }
 0x2a8   : > { %v1815_v10 = vsel %vm1814_vm6, %v3037_v54, %v1811_v49  ;;  %v1487_v54 = vmul.f32 %v4029_v42, %v4217_v28 }
 0x2a9   : > { %v1859_v62 = vmul.f32 %v1815_v10, %v3965_v37  ;;  %v4276_v37 = vmul.f32 %v4070_v30, %v3725_v14 }
 0x2aa   : > { %1209 = vrot.lane.b32.xlu1 %v1190_v23, %s5228_s20  ;;  %1959 = vrot.lane.b32.xlu2 %v1941_v50, %s5228_s20  ;;  %v1757_v23 = vpop.xlane.xlu2 %1756  ;;  %v1819_v50 = vmul.f32 0.5, %v1818_v41  ;;  %v1759_v35 = vpop.xlane.xlu1 %1758 }
 0x2ab   : > { %2013 = vrot.lane.b32.xlu0 %v1996_v32, %s5228_s20  ;;  %v1765_v32 = vmul.f32 %v1755_v45, %v3607_v33  ;;  %v1766_v0 = vmul.f32 %v1757_v23, %v3607_v33  ;;  %v4284_v7 = vmul.f32 %v4056_v21, %v1859_v62  ;;  %v1767_v23 = vmul.f32 %v1759_v35, %v3607_v33 }
 0x2ac   : > { %v1192_v62 = vmul.f32 %v3671_v5, %v4234_v38 }
 0x2ad   : > { %v4248_v16 = vadd.f32 1e-06, %v1765_v32  ;;  %v4255_v4 = vpop.eup %3040  ;;  %v1039_v32 = vmul.f32 %v4210_v31, %v3607_v33 }
 0x2ae   : > { %v1109_v15 = vmul.f32 %v4255_v4, %v4236_v2  ;;  %vm1115_vm10 = vweird.f32 %v4255_v4 }
 0x2af   : > { %3042 = vrsqrt.f32 %v4248_v16  ;;  %v4313_v31 = vadd.f32 1e-06, %v1039_v32  ;;  %vm1116_vm12 = vmor %vm1114_vm11, %vm1115_vm10  ;;  %vm1832_vm0 = vweird.f32 %v4248_v16  ;;  %vm1604_vm10 = vcmask 523264  }
 0x2b0   : > { %v1110_v24 = vmul.f32 %v4255_v4, %v1109_v15  ;;  %vm1613_vm11 = vcmask 785408  }
 0x2b1   : > { %vm1124_vm6 = vweird.f32 %v4313_v31 }
 0x2b2   : > { %1903 = vrot.lane.b32.xlu1 %v1885_v25, %s5228_s20  ;;  %2071 = vrot.lane.b32.xlu2 %v2053_v57, %s5228_s20  ;;  %v1383_v25 = vmul.f32 %v3825_v18, %v4217_v28  ;;  %v4253_v57 = vadd.f32 1e-06, %v1766_v0 }
 0x2b3   : > { %1297 = vrot.lane.b32.xlu0 %v1278_v27, %s5228_s20  ;;  %v1820_v27 = vsub.f32 1.5, %v1819_v50  ;;  %v1111_v50 = vmul.f32 0.5, %v1110_v24 }
 0x2b4   : > { %3044 = vrsqrt.f32 %v4253_v57  ;;  %vm1842_vm15 = vweird.f32 %v4253_v57 }
 0x2b5   : > { %v1821_v29 = vmul.f32 %v4214_v63, %v1820_v27 }
 0x2ba   : > { %2015 = vrot.lane.b32.xlu1 %v1997_v55, %s5228_s20  ;;  %1299 = vrot.lane.b32.xlu2 %v1279_v60, %s5228_s20  ;;  %v1825_v60 = vsel %vm1824_vm9, %v4214_v63, %v1821_v29  ;;  %v1488_v63 = vmul.f32 %v4043_v43, %v4234_v38  ;;  %vm1595_vm9 = vcmask 261120  }
 0x2bb   : > { %1401 = vrot.lane.b32.xlu0 %v1382_v34, %s5228_s20  ;;  %v4280_v34 = vpop.eup %3042  ;;  %v1860_v47 = vmul.f32 %v1825_v60, %v3957_v51  ;;  %v4306_v51 = vadd.f32 1e-06, %v1767_v23 }
 0x2bc   : > { %v4289_v45 = vpop.eup %3044  ;;  %vm1833_vm14 = vweird.f32 %v4280_v34 }
 0x2bd   : > { %v1837_v0 = vmul.f32 %v4289_v45, %v4253_v57  ;;  %v4311_v33 = vmul.f32 %v4056_v21, %v1860_v47  ;;  %3046 = vrsqrt.f32 %v4306_v51  ;;  %vm1843_vm13 = vweird.f32 %v4289_v45  ;;  %vm4384_vm2 = vmor %vm1832_vm0, %vm1833_vm14 }
 0x2be   : > { %3048 = vrsqrt.f32 %v4313_v31  ;;  %vm4370_vm1 = vmor %vm1842_vm15, %vm1843_vm13  ;;  %vm1852_vm5 = vweird.f32 %v4306_v51 }
 0x2bf   : > { %v1838_v49 = vmul.f32 %v4289_v45, %v1837_v0  ;;  %v1943_v27 = vmul.f32 %v4311_v33, %v3697_v26  ;;  %v4332_v26 = vld [vmem:[%s3534_s18 + $0x10] sm:$0xff]  ;;  %v1887_v0 = vmul.f32 %v4311_v33, %v3661_v1 }
 0x2c1   : > { %v1839_v29 = vmul.f32 0.5, %v1838_v49 }
 0x2c2   : > { %1301 = vrot.lane.b32.xlu1 %v1280_v39, %s5228_s20  ;;  %1403 = vrot.lane.b32.xlu2 %v1383_v25, %s5228_s20  ;;  %v1886_v39 = vmul.f32 %v4284_v7, %v3667_v3  ;;  %v1827_v25 = vmul.f32 %v4280_v34, %v4248_v16  ;;  %v1112_v3 = vsub.f32 1.5, %v1111_v50  ;;  %v2054_v50 = vmul.f32 %v4284_v7, %v4031_v59  ;;  %v4375_v59 = vld [vmem:[%s3493_s27 + $0x8] sm:$0xff] }
 0x2c3   : > { %1505 = vrot.lane.b32.xlu0 %v1486_v22, %s5228_s20  ;;  %v1998_v22 = vmul.f32 %v4284_v7, %v3801_v48  ;;  %v1840_v35 = vsub.f32 1.5, %v1839_v29 }
 0x2c4   : > { %v1828_v48 = vmul.f32 %v4280_v34, %v1827_v25  ;;  %v1113_v10 = vmul.f32 %v4255_v4, %v1112_v3  ;;  %v4380_v25 = vld [vmem:[%s3493_s27] sm:$0xff] }
 0x2c5   : > { %v1235_v57 = vmul.f32 %v4380_v25, %v4074_v17  ;;  %v5246_v3 = vld [vmem:[#allocation30_spill] sm:$0xff] }
 0x2c6   : > { %v1829_v15 = vmul.f32 0.5, %v1828_v48  ;;  %v4393_v48 = vld [vmem:[%s3534_s18] sm:$0xff] }
 0x2c8   : > { %v1830_v2 = vsub.f32 1.5, %v1829_v15 }
 0x2ca   : > { %1405 = vrot.lane.b32.xlu1 %v1384_v20, %s5228_s20  ;;  %1507 = vrot.lane.b32.xlu2 %v1487_v54, %s5228_s20  ;;  %v1942_v20 = vmul.f32 %v4284_v7, %v3695_v11  ;;  %v4338_v11 = vpop.eup %3046  ;;  %v1117_v54 = vsel %vm1116_vm12, %v4255_v4, %v1113_v10  ;;  %v1841_v4 = vmul.f32 %v4289_v45, %v1840_v35 }
 0x2cb   : > { %1211 = vrot.lane.b32.xlu0 %v1191_v40, %s5228_s20  ;;  %v4336_v40 = vmul.f32 %v4332_v26, %v4102_v56  ;;  %v4343_v24 = vpop.eup %3048  ;;  %v1134_v47 = vmul.f32 %v1117_v54, %v3980_v52  ;;  %v1847_v32 = vmul.f32 %v4338_v11, %v4306_v51  ;;  %v1831_v52 = vmul.f32 %v4280_v34, %v1830_v2 }
 0x2cc   : > { %v4278_v55 = vpop.permute.xlu2 %2011  ;;  %v1845_v49 = vsel %vm4370_vm1, %v4289_v45, %v1841_v4  ;;  %vm1853_vm3 = vweird.f32 %v4338_v11  ;;  %vm1125_vm4 = vweird.f32 %v4343_v24 }
 0x2cd   : > { %5229 = vst [vmem:[#allocation44_spill] sm:$0xff] %v4336_v40  ;;  %v1848_v16 = vmul.f32 %v4338_v11, %v1847_v32  ;;  %v1862_v45 = vmul.f32 %v1845_v49, %v4004_v58  ;;  %vm1854_vm7 = vmor %vm1852_vm5, %vm1853_vm3 }
 0x2ce   : > { %vm1126_vm8 = vmor %vm1124_vm6, %vm1125_vm4 }
 0x2cf   : > { %v4425_v58 = vmul.f32 %v4056_v21, %v1862_v45 }
 0x2d2   : > { %1509 = vrot.lane.b32.xlu1 %v1488_v63, %s5228_s20  ;;  %2017 = vrot.lane.b32.xlu2 %v1998_v22, %s5228_s20  ;;  %v2055_v63 = vmul.f32 %v4311_v33, %v4029_v42  ;;  %v4367_v42 = vmul.f32 %v4063_v13, %v1134_v47  ;;  %v1236_v22 = vmul.f32 %v4375_v59, %v4117_v36 }
 0x2d3   : > { %1905 = vrot.lane.b32.xlu0 %v1886_v39, %s5228_s20  ;;  %v1119_v39 = vmul.f32 %v4343_v24, %v4313_v31 }
 0x2d4   : > { %v1193_v32 = vmul.f32 %v3679_v6, %v4367_v42  ;;  %v1281_v4 = vmul.f32 %v3709_v9, %v4367_v42 }
 0x2da   : > { %1963 = vrot.lane.b32.xlu1 %v1943_v27, %s5228_s20  ;;  %1213 = vrot.lane.b32.xlu2 %v1192_v62, %s5228_s20  ;;  %v4397_v27 = vmul.f32 %v4393_v48, %v4074_v17  ;;  %v1120_v62 = vmul.f32 %v4343_v24, %v1119_v39 }
 0x2db   : > { %1961 = vrot.lane.b32.xlu0 %v1942_v20, %s5228_s20  ;;  %v1835_v20 = vsel %vm4384_vm2, %v4280_v34, %v1831_v52  ;;  %v4433_v52 = vmul.f32 %v3725_v14, %v4074_v17  ;;  %v1889_v14 = vmul.f32 %v4425_v58, %v3679_v6  ;;  %v3054_v6 = vld [vmem:[%s3493_s27 + $0x10] sm:$0xff] }
 0x2dc   : > { %v4341_v60 = vpop.permute.xlu2 %1207  ;;  %v1861_v34 = vmul.f32 %v1835_v20, %v3975_v61  ;;  %v4429_v61 = vmul.f32 %v3719_v12, %v4117_v36  ;;  %v1237_v45 = vmul.f32 %v3054_v6, %v4102_v56 }
 0x2dd   : > { %5230 = vst [vmem:[#allocation45_spill] sm:$0xff] %v4341_v60 }
 0x2e2   : > { %2075 = vrot.lane.b32.xlu1 %v2055_v63, %s5228_s20  ;;  %1907 = vrot.lane.b32.xlu2 %v1887_v0, %s5228_s20  ;;  %v1849_v63 = vmul.f32 0.5, %v1848_v16  ;;  %v1121_v0 = vmul.f32 0.5, %v1120_v62 }
 0x2e3   : > { %2073 = vrot.lane.b32.xlu0 %v2054_v50, %s5228_s20  ;;  %v1999_v50 = vmul.f32 %v4311_v33, %v3825_v18  ;;  %v4436_v18 = vmul.f32 %v4056_v21, %v1861_v34 }
 0x2e4   : > { %v1294_v10 = vpop.permute.xlu2 %1293  ;;  %v1850_v39 = vsub.f32 1.5, %v1849_v63  ;;  %v5237_v63 = vld [vmem:[#allocation33_spill] sm:$0xff] }
 0x2e5   : > { %v1292_v29 = vpop.permute.xlu0 %1291  ;;  %v4403_v15 = vadd.f32 %v1294_v10, %v1236_v22  ;;  %v4407_v35 = vpop.permute.xlu1 %1203  ;;  %v5235_v10 = vld [vmem:[#allocation34_spill] sm:$0xff]  ;;  %v1944_v20 = vmul.f32 %v4436_v18, %v3705_v8  ;;  %v5236_v8 = vld [vmem:[#allocation39_spill] sm:$0xff] }
 0x2e6   : > { %v4405_v54 = vadd.f32 %v1292_v29, %v1235_v57  ;;  %v1122_v57 = vsub.f32 1.5, %v1121_v0  ;;  %v1851_v49 = vmul.f32 %v4338_v11, %v1850_v39  ;;  %v1385_v29 = vmul.f32 %v5235_v10, %v4367_v42 }
 0x2e7   : > { %v1452_v34 = vmul.f32 %v5236_v8, %v4117_v36 }
 0x2e8   : > { %v1123_v62 = vmul.f32 %v4343_v24, %v1122_v57  ;;  %v1855_v51 = vsel %vm1854_vm7, %v4338_v11, %v1851_v49  ;;  %v5239_v11 = vld [vmem:[#allocation31_spill] sm:$0xff] }
 0x2ea   : > { %1215 = vrot.lane.b32.xlu1 %v1193_v32, %s5228_s20  ;;  %2019 = vrot.lane.b32.xlu2 %v1999_v50, %s5228_s20  ;;  %v1127_v57 = vsel %vm1126_vm8, %v4343_v24, %v1123_v62  ;;  %v2056_v24 = vmul.f32 %v4436_v18, %v4043_v43  ;;  %v5241_v62 = vld [vmem:[#allocation24_spill] sm:$0xff]  ;;  %v4503_v43 = vmul.f32 %v4393_v48, %v4070_v30 }
 0x2eb   : > { %1303 = vrot.lane.b32.xlu0 %v1281_v4, %s5228_s20  ;;  %v1451_v4 = vmul.f32 %v5237_v63, %v4074_v17  ;;  %v2001_v17 = vmul.f32 %v4425_v58, %v5235_v10  ;;  %v1135_v49 = vmul.f32 %v1127_v57, %v5239_v11  ;;  %v5244_v11 = vld [vmem:[#allocation23_spill] sm:$0xff] }
 0x2ec   : > { %v4438_v1 = vpop.permute.xlu2 %1397 }
 0x2ed   : > { %v4440_v22 = vpop.permute.xlu0 %1395 }
 0x2f2   : > { %1911 = vrot.lane.b32.xlu1 %v1889_v14, %s5228_s20  ;;  %1965 = vrot.lane.b32.xlu2 %v1944_v20, %s5228_s20 }
 0x2f3   : > { %1407 = vrot.lane.b32.xlu0 %v1385_v29, %s5228_s20  ;;  %v5238_v29 = vld [vmem:[#allocation32_spill] sm:$0xff] }
 0x2f4   : > { %v1296_v32 = vpop.permute.xlu1 %1295  ;;  %v1502_v0 = vpop.permute.xlu2 %1501  ;;  %v1863_v20 = vmul.f32 %v1855_v51, %v5238_v29  ;;  %v3055_v51 = vld [vmem:[%s3534_s18 + $0x8] sm:$0xff] }
 0x2f5   : > { %v4468_v50 = vadd.f32 %v1296_v32, %v1237_v45  ;;  %v1500_v39 = vpop.permute.xlu0 %1499  ;;  %v4471_v14 = vadd.f32 %v1502_v0, %v1452_v34  ;;  %v5240_v45 = vld [vmem:[#allocation43_spill] sm:$0xff]  ;;  %v4490_v34 = vmul.f32 %v5241_v62, %v4102_v56  ;;  %v4499_v0 = vmul.f32 %v3055_v51, %v4147_v19 }
 0x2f6   : > { %v4473_v31 = vadd.f32 %v1500_v39, %v1451_v4  ;;  %v1489_v32 = vmul.f32 %v5240_v45, %v4367_v42  ;;  %v4493_v10 = vmul.f32 %v4056_v21, %v1863_v20  ;;  %v4506_v39 = vmul.f32 %v4063_v13, %v1135_v49  ;;  %v5245_v20 = vld [vmem:[#allocation42_spill] sm:$0xff] }
 0x2f7   : > { %5242 = vst [vmem:[#allocation34_spill] sm:$0xff] %v4490_v34  ;;  %v1888_v49 = vmul.f32 %v4436_v18, %v3671_v5 }
 0x2f8   : > { %v1946_v48 = vmul.f32 %v4493_v10, %v5244_v11  ;;  %v1282_v13 = vmul.f32 %v5244_v11, %v4506_v39  ;;  %v2058_v11 = vmul.f32 %v4493_v10, %v5245_v20  ;;  %v1386_v5 = vmul.f32 %v5246_v3, %v4506_v39 }
 0x2fa   : > { %2023 = vrot.lane.b32.xlu1 %v2001_v17, %s5228_s20  ;;  %2077 = vrot.lane.b32.xlu2 %v2056_v24, %s5228_s20  ;;  %v1933_v24 = vmul.f32 %v3054_v6, %v4181_v46  ;;  %v1932_v6 = vmul.f32 %v4375_v59, %v4147_v19  ;;  %v5250_v59 = vpack.i.bf16 %v4403_v15, %v4405_v54 }
 0x2fb   : > { %1511 = vrot.lane.b32.xlu0 %v1489_v32, %s5228_s20 }
 0x2fc   : > { %v4495_v4 = vpop.permute.xlu1 %1399  ;;  %v4510_v29 = vpop.permute.xlu2 %1901 }
 0x2fd   : > { %5243 = vst [vmem:[#allocation39_spill] sm:$0xff] %v4495_v4  ;;  %v4512_v21 = vpop.permute.xlu0 %1899  ;;  %v5263_v4 = vld [vmem:[#allocation26_spill] sm:$0xff] }
 0x302   : > { %1969 = vrot.lane.b32.xlu1 %v1946_v48, %s5228_s20  ;;  %1305 = vrot.lane.b32.xlu2 %v1282_v13, %s5228_s20  ;;  %v2000_v48 = vmul.f32 %v4436_v18, %v4015_v53  ;;  %v1931_v13 = vmul.f32 %v4380_v25, %v4070_v30  ;;  %v1490_v25 = vmul.f32 %v5245_v20, %v4506_v39 }
 0x303   : > { %1909 = vrot.lane.b32.xlu0 %v1888_v49, %s5228_s20  ;;  %v5247_v49 = vld [vmem:[#allocation36_spill] sm:$0xff] }
 0x304   : > { %v4527_v32 = vpop.permute.xlu1 %1503  ;;  %v1960_v57 = vpop.permute.xlu2 %1959 }
 0x305   : > { %v1956_v41 = vpop.permute.xlu0 %1955  ;;  %v4530_v17 = vadd.f32 %v1960_v57, %v1933_v24  ;;  %v2045_v24 = vmul.f32 %v4181_v46, %v5247_v49 }
 0x306   : > { %v1979_v16 = vadd.f32 %v1956_v41, %v1931_v13  ;;  %v2043_v41 = vmul.f32 %v4070_v30, %v5237_v63 }
 0x30a   : > { %2081 = vrot.lane.b32.xlu1 %v2058_v11, %s5228_s20  ;;  %1409 = vrot.lane.b32.xlu2 %v1386_v5, %s5228_s20  ;;  %v5248_v5 = vld [vmem:[#allocation22_spill] sm:$0xff] }
 0x30b   : > { %2021 = vrot.lane.b32.xlu0 %v2000_v48, %s5228_s20  ;;  %v1194_v48 = vmul.f32 %v5248_v5, %v4506_v39  ;;  %v1890_v63 = vmul.f32 %v4493_v10, %v5248_v5 }
 0x30c   : > { %v1958_v57 = vpop.permute.xlu1 %1957  ;;  %v2072_v23 = vpop.permute.xlu2 %2071 }
 0x30d   : > { %v1980_v2 = vadd.f32 %v1958_v57, %v1932_v6  ;;  %v2068_v53 = vpop.permute.xlu0 %2067  ;;  %v4547_v47 = vadd.f32 %v2072_v23, %v2045_v24  ;;  %v2044_v23 = vmul.f32 %v4147_v19, %v5236_v8  ;;  %v1945_v57 = vmul.f32 %v4425_v58, %v3709_v9  ;;  %v5251_v24 = vld [vmem:[#allocation25_spill] sm:$0xff] }
 0x30e   : > { %v2091_v20 = vadd.f32 %v2068_v53, %v2043_v41  ;;  %v4588_v53 = vmul.f32 %v5251_v24, %v4217_v28  ;;  %v4592_v9 = vmul.f32 %v4147_v19, %v3719_v12  ;;  %v2057_v12 = vmul.f32 %v4425_v58, %v5240_v45  ;;  %v4660_v41 = vld [vmem:[%s3534_s18 + $0x28] sm:$0xff] }
 0x30f   : > { %v2924_v11 = vpack.i.bf16 %v1980_v2, %v1979_v16  ;;  %v4564_v16 = vmul.f32 %v3055_v51, %v4117_v36  ;;  %v4578_v36 = vld [vmem:[%s3534_s18 + $0x18] sm:$0xff]  ;;  %v4612_v19 = vmul.f32 %v4332_v26, %v4181_v46  ;;  %v5254_v26 = vpack.i.bf16 %v4471_v14, %v4473_v31 }
 0x310   : > { %v4582_v8 = vmul.f32 %v4578_v36, %v4178_v44 }
 0x311   : > { %5252 = vst [vmem:[#allocation33_spill] sm:$0xff] %v4612_v19 }
 0x312   : > { %2915 = vrot.lane.b32.xlu1 %v5250_v59, %s5249_s15  ;;  %1513 = vrot.lane.b32.xlu2 %v1490_v25, %s5228_s20  ;;  %v1453_v59 = vmul.f32 %v5247_v49, %v4102_v56 }
 0x313   : > { %1217 = vrot.lane.b32.xlu0 %v1194_v48, %s5228_s20 }
 0x314   : > { %v2070_v2 = vpop.permute.xlu1 %2069  ;;  %v1300_v6 = vpop.permute.xlu2 %1299 }
 0x315   : > { %v2092_v13 = vadd.f32 %v2070_v2, %v2044_v23  ;;  %v4566_v15 = vpop.permute.xlu0 %1205  ;;  %v2002_v23 = vmul.f32 %v4493_v10, %v5246_v3 }
 0x317   : > { %v2929_v54 = vpack.i.bf16 %v2092_v13, %v2091_v20  ;;  %v4617_v20 = vld [vmem:[%s3493_s27 + $0x18] sm:$0xff] }
 0x318   : > { %v1238_v13 = vmul.f32 %v4617_v20, %v4178_v44 }
 0x31a   : > { %2930 = vrot.lane.b32.xlu1 %v2929_v54, %s5249_s15  ;;  %1913 = vrot.lane.b32.xlu2 %v1890_v63, %s5228_s20 }
 0x31b   : > { %1967 = vrot.lane.b32.xlu0 %v1945_v57, %s5228_s20 }
 0x31c   : > { %v4584_v51 = vpop.permute.xlu1 %1209  ;;  %v4596_v5 = vpop.permute.xlu2 %1403 }
 0x31d   : > { %v4598_v48 = vpop.permute.xlu0 %2013 }
 0x322   : > { %2025 = vrot.lane.b32.xlu2 %v2002_v23, %s5228_s20  ;;  %v4630_v23 = vmul.f32 %v4181_v46, %v5241_v62  ;;  %v4664_v46 = vmul.f32 %v4660_v41, %v4234_v38  ;;  %v5262_v62 = vld [vmem:[#allocation35_spill] sm:$0xff] }
 0x323   : > { %2079 = vrot.lane.b32.xlu0 %v2057_v12, %s5228_s20  ;;  %v5256_v12 = vld [vmem:[#allocation27_spill] sm:$0xff]  ;;  %v1454_v30 = vmul.f32 %v5262_v62, %v4178_v44 }
 0x324   : > { %v4614_v2 = vpop.permute.xlu1 %1903  ;;  %v1508_v3 = vpop.permute.xlu2 %1507  ;;  %5255 = vst [vmem:[#allocation31_spill] sm:$0xff] %v4630_v23  ;;  %v4634_v25 = vmul.f32 %v4284_v7, %v5256_v12 }
 0x325   : > { %5253 = vst [vmem:[#allocation32_spill] sm:$0xff] %v4614_v2  ;;  %v1298_v54 = vpop.permute.xlu0 %1297 }
 0x326   : > { %v1318_v63 = vadd.f32 %v1298_v54, %v1238_v13  ;;  %5257 = vst [vmem:[#allocation43_spill] sm:$0xff] %v4634_v25  ;;  %v4640_v13 = vmul.f32 %v5256_v12, %v4178_v44  ;;  %v3058_v54 = vld [vmem:[%s3493_s27 + $0x20] sm:$0xff]  ;;  %v1525_v25 = vadd.f32 %v4527_v32, %v1453_v59  ;;  %v4677_v44 = vmul.f32 %v5263_v4, %v4234_v38 }
 0x328   : > { %v2934_v57 = vpack.i.bf16 %v1318_v63, %v4468_v50  ;;  %5259 = vst [vmem:[#allocation23_spill] sm:$0xff] %v4640_v13  ;;  %v1239_v63 = vmul.f32 %v3058_v54, %v4217_v28 }
 0x32b   : > { %2920 = vrot.lane.b32.xlu0 %v5254_v26, %s5249_s15  ;;  %v3059_v26 = vld [vmem:[%s3493_s27 + $0x28] sm:$0xff] }
 0x32c   : > { %v4636_v45 = vpop.permute.xlu1 %2015  ;;  %v4642_v50 = vpop.permute.xlu2 %2017  ;;  %v1240_v12 = vmul.f32 %v3059_v26, %v4234_v38  ;;  %v1936_v13 = vmul.f32 %v3059_v26, %v4436_v18 }
 0x32d   : > { %5258 = vst [vmem:[#allocation24_spill] sm:$0xff] %v4636_v45  ;;  %v4646_v31 = vpop.permute.xlu0 %1401  ;;  %v1319_v45 = vadd.f32 %v1300_v6, %v1239_v63 }
 0x32e   : > { %5260 = vst [vmem:[#allocation42_spill] sm:$0xff] %v4642_v50 }
 0x32f   : > { %5261 = vst [vmem:[#allocation30_spill] sm:$0xff] %v4646_v31 }
 0x333   : > { %2925 = vrot.lane.b32.xlu0 %v2924_v11, %s5249_s15 }
 0x334   : > { %v1302_v14 = vpop.permute.xlu1 %1301  ;;  %v4668_v11 = vpop.permute.xlu2 %1213 }
 0x335   : > { %v1320_v23 = vadd.f32 %v1302_v14, %v1240_v12  ;;  %v1506_v50 = vpop.permute.xlu0 %1505  ;;  %v3061_v14 = vld [vmem:[%s3534_s18 + $0x20] sm:$0xff] }
 0x336   : > { %v1526_v49 = vadd.f32 %v1506_v50, %v1454_v30  ;;  %v4683_v63 = vmul.f32 %v3061_v14, %v4311_v33  ;;  %v4686_v32 = vmul.f32 %v3061_v14, %v4217_v28  ;;  %v5265_v50 = vld [vmem:[#allocation38_spill] sm:$0xff]  ;;  %v4705_v14 = vmul.f32 %v4311_v33, %v5251_v24 }
 0x337   : > { %v2949_v2 = vpack.i.bf16 %v1320_v23, %v1319_v45  ;;  %v1456_v12 = vmul.f32 %v5265_v50, %v4234_v38  ;;  %v4709_v30 = vmul.f32 %v4578_v36, %v4284_v7  ;;  %v1935_v24 = vmul.f32 %v3058_v54, %v4311_v33 }
 0x338   : > { %v2939_v19 = vpack.i.bf16 %v1526_v49, %v1525_v25  ;;  %v1934_v36 = vmul.f32 %v4617_v20, %v4284_v7  ;;  %v2048_v20 = vmul.f32 %v4436_v18, %v5265_v50 }
 0x33a   : > { %2940 = vrot.lane.b32.xlu2 %v2939_v19, %s5249_s15 }
 0x33b   : > { %2935 = vrot.lane.b32.xlu0 %v2934_v57, %s5249_s15  ;;  %v5264_v57 = vld [vmem:[#allocation40_spill] sm:$0xff] }
 0x33c   : > { %v4679_v6 = vpop.permute.xlu1 %1405  ;;  %v4690_v25 = vpop.permute.xlu2 %1907  ;;  %v1455_v23 = vmul.f32 %v5264_v57, %v4217_v28  ;;  %v2047_v54 = vmul.f32 %v4311_v33, %v5264_v57  ;;  %v3062_v57 = vld [vmem:[%s3534_s18 + $0x30] sm:$0xff] }
 0x33d   : > { %v4692_v59 = vpop.permute.xlu0 %1211  ;;  %v4743_v50 = vmul.f32 %v3062_v57, %v4367_v42 }
 0x33e   : > { %v1527_v19 = vadd.f32 %v1508_v3, %v1455_v23 }
 0x342   : > { %2950 = vrot.lane.b32.xlu2 %v2949_v2, %s5249_s15 }
 0x344   : > { %v1510_v49 = vpop.permute.xlu1 %1509  ;;  %v4711_v45 = vpop.permute.xlu2 %2019 }
 0x345   : > { %v1528_v56 = vadd.f32 %v1510_v49, %v1456_v12  ;;  %v4713_v2 = vpop.permute.xlu0 %1905 }
 0x347   : > { %v2954_v34 = vpack.i.bf16 %v1528_v56, %v1527_v19 }
 0x34c   : > { %v1964_v31 = vpop.permute.xlu1 %1963  ;;  %v1966_v23 = vpop.permute.xlu2 %1965 }
 0x34d   : > { %v1983_v3 = vadd.f32 %v1964_v31, %v1935_v24  ;;  %v1962_v12 = vpop.permute.xlu0 %1961  ;;  %v1984_v49 = vadd.f32 %v1966_v23, %v1936_v13  ;;  %v2046_v13 = vmul.f32 %v4284_v7, %v5262_v62  ;;  %v3063_v62 = vld [vmem:[%s3493_s27 + $0x38] sm:$0xff]  ;;  %v3064_v24 = vld [vmem:[%s3493_s27 + $0x30] sm:$0xff]  ;;  %s4860_s27 = scalar_lea.vmem [#allocation7], %s3928_s11 }
 0x34e   : > { %v1982_v60 = vadd.f32 %v1962_v12, %v1934_v36  ;;  %v1241_v36 = vmul.f32 %v3064_v24, %v4367_v42  ;;  %s2341_s17 = sshll.u32 %s4860_s27, 4  ;;  %s2342_s17 = int_to_ptr.vmem [resolvable:$true] %s2341_s17 }
 0x34f   : > { %v2959_v40 = vpack.i.bf16 %v1984_v49, %v1983_v3  ;;  %v5280_v3 = vsub.f32 %v4564_v16, %v4566_v15 }
 0x350   : > { %v2944_v28 = vpack.i.bf16 %v1982_v60, %v4530_v17 }
 0x351   : > { %2960 = vrot.lane.b32.xlu2 %v2959_v40, %s5249_s15 }
 0x352   : > { %2945 = vrot.lane.b32.xlu1 %v2944_v28, %s5249_s15  ;;  %v1242_v28 = vmul.f32 %v3063_v62, %v4506_v39 }
 0x354   : > { %v2076_v26 = vpop.permute.xlu1 %2075  ;;  %v2078_v60 = vpop.permute.xlu2 %2077 }
 0x355   : > { %v4732_v31 = vadd.f32 %v2076_v26, %v2047_v54  ;;  %v2074_v17 = vpop.permute.xlu0 %2073  ;;  %v4734_v56 = vadd.f32 %v2078_v60, %v2048_v20  ;;  %v4755_v54 = vmul.f32 %v3062_v57, %v4425_v58  ;;  %v5268_v20 = vld [vmem:[#allocation28_spill] sm:$0xff]  ;;  %v5270_v60 = vld [vmem:[#allocation29_spill] sm:$0xff] }
 0x356   : > { %v2094_v40 = vadd.f32 %v2074_v17, %v2046_v13  ;;  %v4761_v13 = vmul.f32 %v5268_v20, %v4506_v39  ;;  %v4765_v17 = vmul.f32 %v5270_v60, %v4367_v42 }
 0x357   : > { %5266 = vst [vmem:[#allocation36_spill] sm:$0xff] %v4755_v54  ;;  %v3065_v54 = vld [vmem:[%s3534_s18 + $0x38] sm:$0xff]  ;;  %s4898_s18 = scalar_lea.vmem [#allocation8], %s3928_s11  ;;  %s5323_s11 = sld [smem:[#allocation50_spill]] }
 0x358   : > { %v2979_v33 = vpack.i.bf16 %v2094_v40, %v4547_v47  ;;  %5269 = vst [vmem:[#allocation25_spill] sm:$0xff] %v4761_v13  ;;  %v4796_v13 = vmul.f32 %v4660_v41, %v4436_v18 }
 0x35a   : > { %2955 = vrot.lane.b32.xlu1 %v2954_v34, %s5249_s15  ;;  %2980 = vrot.lane.b32.xlu2 %v2979_v33, %s5249_s15 }
 0x35c   : > { %v4745_v7 = vpop.permute.xlu1 %1215  ;;  %v1306_v47 = vpop.permute.xlu2 %1305 }
 0x35d   : > { %v1304_v23 = vpop.permute.xlu0 %1303  ;;  %v1322_v34 = vadd.f32 %v1306_v47, %v1242_v28  ;;  %v4779_v47 = vmul.f32 %v4425_v58, %v5270_v60  ;;  %s2340_s16 = scalar_lea.hbm %s5323_s11, %s4979_s26  ;;  %s3146_s24 = scalar_lea.hbm %s5323_s11, 64 }
 0x35e   : > { %v1321_v12 = vadd.f32 %v1304_v23, %v1241_v36  ;;  %s2343_s29 = sshll.u32 %s2340_s16, 4  ;;  %s2344_s29 = int_to_ptr.hbm [resolvable:$true] %s2343_s29 }
 0x35f   : > { %5273 = vst [vmem:[#allocation26_spill] sm:$0xff] %v4779_v47  ;;  %s3140_s13 = sshra.s32 %s2344_s29, 4  ;;  %s3141_s13 = int_to_ptr.hbm [resolvable:$true] %s3140_s13 }
 0x360   : > { %v2964_v49 = vpack.i.bf16 %v1322_v34, %v1321_v12  ;;  %v5275_v34 = vld [vmem:[#allocation41_spill] sm:$0xff]  ;;  %s3142_s20 = scalar_lea.hbm %s3141_s13, 32  ;;  %p3147_p8 = scmp.lt.s32.totalorder %s3141_s13, %s5323_s11 }
 0x361   : > { %v1458_v12 = vmul.f32 %v5275_v34, %v4506_v39  ;;  %p3143_p5 = scmp.ne.s32.totalorder %s3141_s13, %s3142_s20  ;;  %p3148_p10 = scmp.lt.s32.totalorder %s3146_s24, %s3142_s20 }
 0x362   : > { %2965 = vrot.lane.b32.xlu1 %v2964_v49, %s5249_s15  ;;  %v5276_v49 = vld [vmem:[#allocation37_spill] sm:$0xff] }
 0x363   : > { %v1457_v40 = vmul.f32 %v5276_v49, %v4367_v42  ;;  %p3144_p6 = pnand %p3143_p5, %p3414_p9  ;;  %p3149_p13 = por %p3148_p10, %p3147_p8 }
 0x364   : > { %v4757_v26 = vpop.permute.xlu1 %1911  ;;  %v4769_v33 = vpop.permute.xlu2 %1409 }
 0x365   : > { %5267 = vst [vmem:[#allocation22_spill] sm:$0xff] %v4757_v26  ;;  %v4771_v28 = vpop.permute.xlu0 %1407  ;;  %p3145_p7 = pneg %p3144_p6 }
 0x366   : > { %5271 = vst [vmem:[#allocation27_spill] sm:$0xff] %v4769_v33  ;;  %v4792_v33 = vmul.f32 %v3065_v54, %v4493_v10 }
 0x367   : > { %5272 = vst [vmem:[#allocation35_spill] sm:$0xff] %v4771_v28  ;;  %p3150_p0 = pnand %p3149_p13, %p3145_p7 }
 0x36c   : > { %v4781_v23 = vpop.permute.xlu1 %2023  ;;  %v1514_v38 = vpop.permute.xlu2 %1513 }
 0x36d   : > { %5274 = vst [vmem:[#allocation40_spill] sm:$0xff] %v4781_v23  ;;  %v1512_v57 = vpop.permute.xlu0 %1511  ;;  %v1530_v19 = vadd.f32 %v1514_v38, %v1458_v12 }
 0x36e   : > { %v1529_v26 = vadd.f32 %v1512_v57, %v1457_v40  ;;  %v4808_v40 = vmul.f32 %v4493_v10, %v5268_v20  ;;  %v4812_v57 = vmul.f32 %v4436_v18, %v5263_v4  ;;  %v5279_v4 = vsub.f32 %v4397_v27, %v4407_v35 }
 0x36f   : > { %v1937_v27 = vmul.f32 %v3064_v24, %v4425_v58  ;;  %v5283_v24 = vpack.i.bf16 %v4734_v56, %v4732_v31 }
 0x370   : > { %v2969_v36 = vpack.i.bf16 %v1530_v19, %v1529_v26  ;;  %5277 = vst [vmem:[#allocation38_spill] sm:$0xff] %v4808_v40  ;;  %v4823_v19 = vmul.f32 %v3065_v54, %v4506_v39  ;;  %v5281_v39 = vsub.f32 %v4433_v52, %v4440_v22  ;;  %v1938_v40 = vmul.f32 %v3063_v62, %v4493_v10 }
 0x371   : > { %v2050_v52 = vmul.f32 %v4493_v10, %v5275_v34  ;;  %v2049_v22 = vmul.f32 %v4425_v58, %v5276_v49 }
 0x372   : > { %2970 = vrot.lane.b32.xlu0 %v2969_v36, %s5249_s15 }
 0x374   : > { %v1970_v60 = vpop.permute.xlu1 %1969  ;;  %v4798_v42 = vpop.permute.xlu2 %1913 }
 0x375   : > { %v4800_v28 = vpop.permute.xlu0 %1909 }
 0x37c   : > { %v2082_v26 = vpop.permute.xlu1 %2081  ;;  %v4814_v41 = vpop.permute.xlu2 %2025 }
 0x37d   : > { %5278 = vst [vmem:[#allocation28_spill] sm:$0xff] %v4814_v41  ;;  %v4816_v36 = vpop.permute.xlu0 %2021 }
 0x384   : > { %v2916_v38 = vpop.permute.xlu1 %2915 }
 0x385   : > { %v2918_v20 = vunpack.i.h.bf16 %v2916_v38  ;;  %v2917_v23 = vunpack.i.l.bf16 %v2916_v38  ;;  %v4825_v47 = vpop.permute.xlu0 %1217  ;;  %v5282_v38 = vsub.f32 %v4429_v61, %v4438_v1  ;;  %v2098_v1 = vadd.f32 %v2082_v26, %v2050_v52 }
 0x386   : > { %v5287_v52 = vsub.f32 %v4686_v32, %v4692_v59  ;;  %v5290_v32 = vsub.f32 %v4588_v53, %v4596_v5  ;;  %v5292_v53 = vsub.f32 %v4683_v63, %v4690_v25  ;;  %v5298_v63 = vld [vmem:[#allocation23_spill] sm:$0xff]  ;;  %v5299_v25 = vld [vmem:[#allocation30_spill] sm:$0xff] }
 0x387   : > { %v1596_v12 = vsel %vm1595_vm9, %v5279_v4, %v2917_v23  ;;  %v1597_v41 = vsel %vm1595_vm9, %v5280_v3, %v2918_v20  ;;  %v1986_v23 = vadd.f32 %v1970_v60, %v1938_v40 }
 0x388   : > { %v1605_v54 = vsel %vm1604_vm10, %v1596_v12, %v5281_v39  ;;  %v1606_v18 = vsel %vm1604_vm10, %v1597_v41, %v5282_v38 }
 0x38c   : > { %v2931_v41 = vpop.permute.xlu1 %2930 }
 0x38d   : > { %v1968_v35 = vpop.permute.xlu0 %1967  ;;  %v2933_v38 = vunpack.i.h.bf16 %v2931_v41 }
 0x38e   : > { %v1985_v4 = vadd.f32 %v1968_v35, %v1937_v27  ;;  %v2932_v27 = vunpack.i.l.bf16 %v2931_v41  ;;  %v5285_v35 = vsub.f32 %v4503_v43, %v4512_v21  ;;  %v5289_v43 = vsub.f32 %v4276_v37, %v4278_v55 }
 0x390   : > { %v2974_v16 = vpack.i.bf16 %v1986_v23, %v1985_v4  ;;  %v5286_v4 = vsub.f32 %v4664_v46, %v4668_v11 }
 0x392   : > { %2975 = vrot.lane.b32.xlu0 %v2974_v16, %s5249_s15 }
 0x394   : > { %v2941_v3 = vpop.permute.xlu2 %2940 }
 0x395   : > { %v2080_v61 = vpop.permute.xlu0 %2079 }
 0x396   : > { %v2097_v15 = vadd.f32 %v2080_v61, %v2049_v22 }
 0x398   : > { %v2989_v62 = vpack.i.bf16 %v2098_v1, %v2097_v15 }
 0x39a   : > { %2985 = vrot.lane.b32.xlu0 %v5283_v24, %s5249_s15  ;;  %2990 = vrot.lane.b32.xlu1 %v2989_v62, %s5249_s15 }
 0x39c   : > { %v2951_v26 = vpop.permute.xlu2 %2950 }
 0x39d   : > { %v2921_v60 = vpop.permute.xlu0 %2920  ;;  %v2953_v12 = vunpack.i.h.bf16 %v2951_v26  ;;  %v2952_v31 = vunpack.i.l.bf16 %v2951_v26 }
 0x39e   : > { %v2923_v40 = vunpack.i.h.bf16 %v2921_v60  ;;  %v2922_v10 = vunpack.i.l.bf16 %v2921_v60  ;;  %v2943_v60 = vunpack.i.h.bf16 %v2941_v3 }
 0x39f   : > { %v1601_v16 = vsel %vm1595_vm9, %v5286_v4, %v2953_v12  ;;  %v1600_v22 = vsel %vm1595_vm9, %v5287_v52, %v2952_v31  ;;  %v5300_v12 = vsub.f32 %v5298_v63, %v5299_v25 }
 0x3a0   : > { %v1615_v34 = vsel %vm1613_vm11, %v1606_v18, %v2923_v40  ;;  %v1614_v58 = vsel %vm1613_vm11, %v1605_v54, %v2922_v10  ;;  %v5284_v18 = vsub.f32 %v4499_v0, %v4510_v29  ;;  %v5288_v0 = vsub.f32 %v4592_v9, %v4598_v48 }
 0x3a1   : > { %v2758_v49 = vpack.c.bf16 %v1615_v34, %v1614_v58  ;;  %v1609_v59 = vsel %vm1604_vm10, %v1600_v22, %v5290_v32  ;;  %v5291_v9 = vsub.f32 %v4677_v44, %v4679_v6  ;;  %v5293_v44 = vsub.f32 %v4796_v13, %v4800_v28  ;;  %v5295_v58 = vld [vmem:[#allocation44_spill] sm:$0xff]  ;;  %v5301_v13 = vld [vmem:[#allocation34_spill] sm:$0xff]  ;;  %v5302_v28 = vld [vmem:[#allocation39_spill] sm:$0xff] }
 0x3a2   : > { %v2942_v40 = vunpack.i.l.bf16 %v2941_v3  ;;  %v5294_v10 = vsub.f32 %v4582_v8, %v4584_v51  ;;  %v5306_v22 = vsub.f32 %v4709_v30, %v4713_v2 }
 0x3a3   : > { %2759 = vst [vmem:[%s4860_s27] sm:$0xff] %v2758_v49   ;;  %v1610_v48 = vsel %vm1604_vm10, %v1601_v16, %v5291_v9  ;;  %v5296_v49 = vld [vmem:[#allocation45_spill] sm:$0xff] }
 0x3a4   : > { %v5297_v26 = vsub.f32 %v5295_v58, %v5296_v49  ;;  %v5320_v49 = vld [vmem:[#allocation25_spill] sm:$0xff] }
 0x3a5   : > { %v2926_v56 = vpop.permute.xlu0 %2925 }
 0x3a6   : > { %v2928_v20 = vunpack.i.h.bf16 %v2926_v56  ;;  %v2927_v39 = vunpack.i.l.bf16 %v2926_v56  ;;  %v5303_v56 = vsub.f32 %v5301_v13, %v5302_v28 }
 0x3a8   : > { %v2164_v54 = vsel %vm1595_vm9, %v5284_v18, %v2928_v20  ;;  %v2163_v23 = vsel %vm1595_vm9, %v5285_v35, %v2927_v39 }
 0x3a9   : > { %v2172_v29 = vsel %vm1604_vm10, %v2164_v54, %v5288_v0  ;;  %v2171_v21 = vsel %vm1604_vm10, %v2163_v23, %v5289_v43  ;;  %v5304_v54 = vsub.f32 %v4705_v14, %v4711_v45  ;;  %v5305_v23 = vsub.f32 %v4812_v57, %v4816_v36  ;;  %v5308_v43 = vld [vmem:[#allocation32_spill] sm:$0xff]  ;;  %v5313_v36 = vld [vmem:[#allocation31_spill] sm:$0xff] }
 0x3aa   : > { %v2180_v61 = vsel %vm1613_vm11, %v2172_v29, %v2933_v38  ;;  %v2179_v46 = vsel %vm1613_vm11, %v2171_v21, %v2932_v27  ;;  %v5307_v29 = vld [vmem:[#allocation33_spill] sm:$0xff]  ;;  %v5310_v21 = vld [vmem:[#allocation43_spill] sm:$0xff] }
 0x3ab   : > { %v2778_v11 = vpack.c.bf16 %v2180_v61, %v2179_v46  ;;  %v2961_v1 = vpop.permute.xlu2 %2960  ;;  %v5309_v45 = vsub.f32 %v5307_v29, %v5308_v43  ;;  %v5311_v61 = vld [vmem:[#allocation42_spill] sm:$0xff] }
 0x3ac   : > { %v2963_v37 = vunpack.i.h.bf16 %v2961_v1  ;;  %v2962_v55 = vunpack.i.l.bf16 %v2961_v1  ;;  %v5312_v46 = vsub.f32 %v5310_v21, %v5311_v61 }
 0x3ad   : > { %2779 = vst [vmem:[%s4898_s18] sm:$0xff] %v2778_v11   ;;  %v2936_v15 = vpop.permute.xlu0 %2935  ;;  %v5314_v11 = vld [vmem:[#allocation24_spill] sm:$0xff] }
 0x3ae   : > { %v2938_v62 = vunpack.i.h.bf16 %v2936_v15  ;;  %v2937_v24 = vunpack.i.l.bf16 %v2936_v15  ;;  %v2167_v5 = vsel %vm1595_vm9, %v5292_v53, %v2962_v55  ;;  %v2168_v6 = vsel %vm1595_vm9, %v5293_v44, %v2963_v37 }
 0x3af   : > { %v4932_v35 = vsel %vm1604_vm10, %v2167_v5, %v5304_v54  ;;  %v4938_v4 = vsel %vm1604_vm10, %v2168_v6, %v5305_v23  ;;  %v5315_v1 = vsub.f32 %v5313_v36, %v5314_v11 }
 0x3b0   : > { %v1599_v34 = vsel %vm1595_vm9, %v5294_v10, %v2938_v62  ;;  %v1598_v41 = vsel %vm1595_vm9, %v5297_v26, %v2937_v24  ;;  %v5317_v10 = vsub.f32 %v4823_v19, %v4825_v47  ;;  %v5321_v26 = vld [vmem:[#allocation27_spill] sm:$0xff] }
 0x3b1   : > { %v1608_v31 = vsel %vm1604_vm10, %v1599_v34, %v5300_v12  ;;  %v1607_v3 = vsel %vm1604_vm10, %v1598_v41, %v5303_v56  ;;  %v5322_v41 = vsub.f32 %v5320_v49, %v5321_v26 }
 0x3b2   : > { %v1617_v20 = vsel %vm1613_vm11, %v1608_v31, %v2943_v60  ;;  %v1616_v8 = vsel %vm1613_vm11, %v1607_v3, %v2942_v40  ;;  %v5316_v60 = vsub.f32 %v4743_v50, %v4745_v7 }
 0x3b3   : > { %v2763_v51 = vpack.c.bf16 %v1617_v20, %v1616_v8 }
 0x3b4   : > { %v2981_v39 = vpop.permute.xlu2 %2980 }
 0x3b5   : > { %2815 = vst [vmem:[%s4860_s27 + $0x8] sm:$0xff] %v2763_v51   ;;  %v2983_v16 = vunpack.i.h.bf16 %v2981_v39  ;;  %v2982_v52 = vunpack.i.l.bf16 %v2981_v39 }
 0x3c4   : > { %v2946_v38 = vpop.permute.xlu1 %2945 }
 0x3c5   : > { %v2948_v27 = vunpack.i.h.bf16 %v2946_v38  ;;  %v2947_v18 = vunpack.i.l.bf16 %v2946_v38 }
 0x3c7   : > { %v2166_v0 = vsel %vm1595_vm9, %v5306_v22, %v2948_v27  ;;  %v2165_v14 = vsel %vm1595_vm9, %v5309_v45, %v2947_v18 }
 0x3c8   : > { %v2174_v57 = vsel %vm1604_vm10, %v2166_v0, %v5312_v46  ;;  %v2173_v32 = vsel %vm1604_vm10, %v2165_v14, %v5315_v1 }
 0x3c9   : > { %v2181_v9 = vsel %vm1613_vm11, %v2173_v32, %v2982_v52  ;;  %v2182_v30 = vsel %vm1613_vm11, %v2174_v57, %v2983_v16 }
 0x3ca   : > { %v2783_v2 = vpack.c.bf16 %v2182_v30, %v2181_v9 }
 0x3cc   : > { %2818 = vst [vmem:[%s4898_s18 + $0x8] sm:$0xff] %v2783_v2   ;;  %v2956_v37 = vpop.permute.xlu1 %2955 }
 0x3cd   : > { %v2958_v55 = vunpack.i.h.bf16 %v2956_v37  ;;  %v2957_v15 = vunpack.i.l.bf16 %v2956_v37 }
 0x3cf   : > { %v1619_v62 = vsel %vm1613_vm11, %v1610_v48, %v2958_v55  ;;  %v1618_v24 = vsel %vm1613_vm11, %v1609_v59, %v2957_v15  ;;  %v5318_v48 = vld [vmem:[#allocation35_spill] sm:$0xff] }
 0x3d0   : > { %v2768_v53 = vpack.c.bf16 %v1619_v62, %v1618_v24  ;;  %v5319_v58 = vsub.f32 %v4765_v17, %v5318_v48 }
 0x3d2   : > { %2816 = vst [vmem:[%s4860_s27 + $0x10] sm:$0xff] %v2768_v53  }
 0x3d4   : > { %v2966_v5 = vpop.permute.xlu1 %2965 }
 0x3d5   : > { %v2968_v44 = vunpack.i.h.bf16 %v2966_v5  ;;  %v2967_v6 = vunpack.i.l.bf16 %v2966_v5 }
 0x3d7   : > { %v1602_v40 = vsel %vm1595_vm9, %v5316_v60, %v2967_v6  ;;  %v1603_v34 = vsel %vm1595_vm9, %v5317_v10, %v2968_v44 }
 0x3d8   : > { %v1611_v59 = vsel %vm1604_vm10, %v1602_v40, %v5319_v58  ;;  %v1612_v63 = vsel %vm1604_vm10, %v1603_v34, %v5322_v41 }
 0x3e4   : > { %v2971_v50 = vpop.permute.xlu0 %2970 }
 0x3e5   : > { %v2973_v7 = vunpack.i.h.bf16 %v2971_v50  ;;  %v2972_v17 = vunpack.i.l.bf16 %v2971_v50 }
 0x3e7   : > { %v1621_v47 = vsel %vm1613_vm11, %v1612_v63, %v2973_v7  ;;  %v1620_v19 = vsel %vm1613_vm11, %v1611_v59, %v2972_v17 }
 0x3e8   : > { %v2773_v25 = vpack.c.bf16 %v1621_v47, %v1620_v19 }
 0x3ea   : > { %2817 = vst [vmem:[%s4860_s27 + $0x18] sm:$0xff] %v2773_v25  }
 0x3eb   : > { %3153 = shalt.err (!%p3150_p0)
}
 0x3ec   : > { %s5182_s14 = smov 4   ;;  %s5325_s27 = smov 64   ;;  %v5327_v28 = vsub.f32 %v4792_v33, %v4798_v42  ;;  %v5328_v3 = vld [vmem:[#allocation36_spill] sm:$0xff]  ;;  %v5329_v20 = vld [vmem:[#allocation22_spill] sm:$0xff] }
 0x3ed   : > { %2836 = dma.vmem_to_hbm [thread:$0]  (%p3414_p9), %s2342_s17, 512, %s2344_s29, %s2317_s21, %s5325_s27, %s5325_s27, %s5182_s14   ;;  %v5330_v8 = vsub.f32 %v5328_v3, %v5329_v20  ;;  %v5331_v39 = vld [vmem:[#allocation26_spill] sm:$0xff]  ;;  %v5332_v38 = vld [vmem:[#allocation40_spill] sm:$0xff] }
 0x3ee   : > { %s5326_s15 = sld [smem:[#allocation17_spill]]  ;;  %v5333_v27 = vsub.f32 %v5331_v39, %v5332_v38  ;;  %v5334_v54 = vld [vmem:[#allocation38_spill] sm:$0xff]  ;;  %v5335_v23 = vld [vmem:[#allocation28_spill] sm:$0xff]  ;;  %s2360_s16 = sshll.u32 %s4898_s18, 4  ;;  %s2361_s16 = int_to_ptr.vmem [resolvable:$true] %s2360_s16 }
 0x3ef   : > { %v5336_v16 = vsub.f32 %v5334_v54, %v5335_v23  ;;  %s5337_s29 = sld [smem:[#allocation51_spill]]  ;;  %s2379_s2 = sshll.u32 %s3938_s28, 4  ;;  %s5041_s2 = int_to_ptr.vmem [resolvable:$true] %s2379_s2 }
 0x3f0   : > { %s5338_s25 = sld [smem:[#allocation52_spill]] }
 0x3f4   : > { %s2321_s14 = sand.u32 1, %s5326_s15  }
 0x3f5   : > { %s2359_s21 = scalar_lea.hbm %s5337_s29, %s4979_s26  ;;  %s5046_s28 = scalar_lea.sflag [#allocation9], %s2321_s14 }
 0x3f6   : > { %s2378_s24 = scalar_lea.hbm %s5338_s25, %s4979_s26  ;;  %s5029_s1 = sshll.u32 %s2359_s21, 4  ;;  %s2363_s1 = int_to_ptr.hbm [resolvable:$true] %s5029_s1 }
 0x3f7   : > { %s5038_s26 = sshll.u32 %s2378_s24, 4  ;;  %s3168_s15 = sshra.s32 %s2363_s1, 4  ;;  %s2382_s26 = int_to_ptr.hbm [resolvable:$true] %s5038_s26  ;;  %s3169_s15 = int_to_ptr.hbm [resolvable:$true] %s3168_s15 }
 0x3f8   : > { %s3170_s0 = scalar_lea.hbm %s3169_s15, 32  ;;  %s3174_s13 = scalar_lea.hbm %s5337_s29, 64 }
 0x3f9   : > { %p3171_p1 = scmp.ne.s32.totalorder %s3169_s15, %s3170_s0  ;;  %p3175_p4 = scmp.lt.s32.totalorder %s3169_s15, %s5337_s29 }
 0x3fa   : > { %p3176_p5 = scmp.lt.s32.totalorder %s3174_s13, %s3170_s0 }
 0x3fb   : > { %p3172_p2 = pnand %p3171_p1, %p3414_p9 }
 0x3fc   : > { %p3177_p6 = por %p3176_p5, %p3175_p4 }
 0x3fd   : > { %p3173_p3 = pneg %p3172_p2 }
 0x3ff   : > { %p3178_p7 = pnand %p3177_p6, %p3173_p3 }
 0x404   : > { %v2976_v12 = vpop.permute.xlu0 %2975 }
 0x405   : > { %v2978_v31 = vunpack.i.h.bf16 %v2976_v12  ;;  %v2977_v13 = vunpack.i.l.bf16 %v2976_v12 }
 0x407   : > { %v2170_v56 = vsel %vm1595_vm9, %v5327_v28, %v2978_v31  ;;  %v2169_v51 = vsel %vm1595_vm9, %v5330_v8, %v2977_v13 }
 0x408   : > { %v2177_v18 = vsel %vm1604_vm10, %v2169_v51, %v5333_v27  ;;  %v2178_v52 = vsel %vm1604_vm10, %v2170_v56, %v5336_v16 }
 0x40c   : > { %v2991_v33 = vpop.permute.xlu1 %2990  ;;  %v2986_v42 = vpop.permute.xlu0 %2985 }
 0x40d   : > { %v2993_v22 = vunpack.i.h.bf16 %v2991_v33  ;;  %v2992_v0 = vunpack.i.l.bf16 %v2991_v33  ;;  %v2988_v29 = vunpack.i.h.bf16 %v2986_v42  ;;  %v2987_v43 = vunpack.i.l.bf16 %v2986_v42 }
 0x40f   : > { %v2185_v45 = vsel %vm1613_vm11, %v2177_v18, %v2992_v0  ;;  %v2186_v14 = vsel %vm1613_vm11, %v2178_v52, %v2993_v22  ;;  %v2184_v21 = vsel %vm1613_vm11, %v4938_v4, %v2988_v29  ;;  %v2183_v61 = vsel %vm1613_vm11, %v4932_v35, %v2987_v43 }
 0x410   : > { %v2793_v46 = vpack.c.bf16 %v2186_v14, %v2185_v45  ;;  %v2788_v57 = vpack.c.bf16 %v2184_v21, %v2183_v61 }
 0x412   : > { %2820 = vst [vmem:[%s4898_s18 + $0x18] sm:$0xff] %v2793_v46  }
 0x413   : > { %2819 = vst [vmem:[%s4898_s18 + $0x10] sm:$0xff] %v2788_v57  }
 0x414   : > { %3181 = shalt.err (!%p3178_p7)
}
 0x415   : > { %s5339_s18 = smov 4   ;;  %s3196_s14 = sshra.s32 %s2382_s26, 4  ;;  %s3197_s14 = int_to_ptr.hbm [resolvable:$true] %s3196_s14 }
 0x416   : > { %2837 = dma.vmem_to_hbm [thread:$0]  (%p3414_p9), %s2361_s16, 512, %s2363_s1, %s5046_s28, %s5325_s27, %s5325_s27, %s5339_s18  }
 0x417   : > { %s3198_s17 = scalar_lea.hbm %s3197_s14, 32  ;;  %s3202_s21 = scalar_lea.hbm %s5338_s25, 64 }
 0x418   : > { %p3199_p8 = scmp.ne.s32.totalorder %s3197_s14, %s3198_s17  ;;  %p3203_p0 = scmp.lt.s32.totalorder %s3197_s14, %s5338_s25 }
 0x419   : > { %p3204_p1 = scmp.lt.s32.totalorder %s3202_s21, %s3198_s17 }
 0x41a   : > { %p3200_p10 = pnand %p3199_p8, %p3414_p9 }
 0x41b   : > { %p3205_p2 = por %p3204_p1, %p3203_p0 }
 0x41c   : > { %p3201_p13 = pneg %p3200_p10 }
 0x41e   : > { %p3206_p3 = pnand %p3205_p2, %p3201_p13 }
 0x420   : > { %3209 = shalt.err (!%p3206_p3)
}
 0x421   : > { %2838 = dma.vmem_to_hbm [thread:$0]  (%p3414_p9), %s5041_s2, 512, %s2382_s26, %s5046_s28, %s5325_s27, %s5325_s27, %s5339_s18  }
 0x422 PF: > { %s5340_s1 = sld [smem:[#allocation15_spill]]  ;;  %p2850_p4 = pnand %p2607_p12, %p3423_p11 }
 0x424   : > { %p2851_p5 = pneg %p2850_p4 }
 0x428   : > { %s2396_s24 = sand.u32 1, %s5340_s1  }
 0x429   : > { %s2397_s14 = scalar_lea.sflag [#allocation4], %s2396_s24 }
 0x42a   : > { %3243 = dma.done.wait (%p2851_p5), %s2397_s14, 512  }
 0x42b   : > { %3245 = vsyncadd (%p2851_p5), %s2397_s14, 4294966784  ;;  %s5342_s30 = sadd.s32 4294967294, %s3272_s23  }
 0x42c   : > { %s2406_s17 = sand.u32 1, %s5342_s30  }
 0x42d   : > { %s2407_s15 = scalar_lea.sflag [#allocation9], %s2406_s17 }
 0x42e   : > { %3247 = dma.done.wait (%p2851_p5), %s2407_s15, 1024  }
 0x42f   : > { %3249 = vsyncadd (%p2851_p5), %s2407_s15, 4294966272  ;;  %s38_s23 = sadd.s32 1, %s3272_s23   ;;  %s5343_s2 = sld [smem:[#allocation16_spill]] }
 0x430   : > { %p35_p9 = scmp.ge.s32.totalorder %s38_s23, 4   ;;  %s5344_s20 = sld [smem:[#allocation20_spill]] }
 0x431   : > { %s5345_s27 = sld [smem:[#allocation18_spill]]  ;;  %s5346_s18 = smov %s3256_s19 }
 0x432   : > { %s5348_s21 = smov %s3268_s22 }
 0x433   :  { %37 = sbr.rel (!%p35_p9) target bundleno = 18 (0x12), region = 171 }
 0x435   : > { %s5347_s19 = smov %s5343_s2 }
 0x437   : > { %s5349_s22 = smov %s5345_s27 }
 0x438   :  { %2423 = vsyncpa [#allocation3], 1 }
 0x439   :  { %2425 = vsyncpa [#allocation3 + $0x1], 1 }
 0x43a   :  { %2426 = vsyncpa [#allocation6], 1 }
 0x43b   :  { %2428 = vsyncpa [#allocation6 + $0x1], 1 }
 0x43c   :  { %2429 = vsyncpa [#allocation4], 1 }
 0x43d   :  { %2431 = vsyncpa [#allocation4 + $0x1], 1 }
 0x43e   :  { %2432 = vsyncpa [#allocation9], 1 }
 0x43f   :  { %2434 = vsyncpa [#allocation9 + $0x1], 1 }

</bundles_post_ra>
